<compile_context>
chip_gen: v7x
topology: tpu7x:2x2x1
jax: 0.10.0
libtpu: 0.0.40
codegen_flags: <defaults>
</compile_context>

<pallas_src>
import functools
import math

import jax
import jax.numpy as jnp
import numpy as np
from jax import lax
from jax.experimental import pallas as pl
from jax.experimental.pallas import tpu as pltpu

_LM_TILE_V = 1024      # lane-dense lm_head vocab tile (multiple of 256)


# ----------------------------------------------------------------------------
# Shared math helpers (f32)
# ----------------------------------------------------------------------------
def _layernorm(x, w, b, eps=1e-5):
    mu = jnp.mean(x, axis=-1, keepdims=True)
    var = jnp.mean((x - mu) ** 2, axis=-1, keepdims=True)
    return (x - mu) * lax.rsqrt(var + eps) * w + b


def _erf_poly(x):
    # Abramowitz & Stegun 7.1.26, |error| <= 1.5e-7; uses only exp/mul/add/select
    # so the kernel keeps PyTorch nn.GELU() exact-erf semantics without relying
    # on a lax.erf lowering inside Mosaic.
    a1, a2, a3, a4, a5 = (0.254829592, -0.284496736, 1.421413741,
                          -1.453152027, 1.061405429)
    p = 0.3275911
    ax = jnp.abs(x)
    t = 1.0 / (1.0 + p * ax)
    poly = ((((a5 * t + a4) * t + a3) * t + a2) * t + a1) * t
    y = 1.0 - poly * jnp.exp(-(ax * ax))
    return jnp.where(x < 0.0, -y, y)


def _gelu_exact_kernel(x):
    return 0.5 * x * (1.0 + _erf_poly(x * (1.0 / math.sqrt(2.0))))


def _gelu_exact_ref(x):
    return 0.5 * x * (1.0 + lax.erf(x * (1.0 / math.sqrt(2.0))))


# ----------------------------------------------------------------------------
# Pallas kernels
# ----------------------------------------------------------------------------
def gpt_blocks_kernel(x_ref,
                      ln1w_ref, ln1b_ref,
                      wqkv_ref, bqkv_ref,
                      wproj_ref, bproj_ref,
                      ln2w_ref, ln2b_ref,
                      wfc_ref, bfc_ref,
                      wfc2_ref, bfc2_ref,
                      o_ref,
                      *, n_head):
    """All transformer blocks for one batch chunk.

    grid = (B // Bc, n_layer); the layer axis is the inner ("arbitrary") axis
    and the output block index is constant along it, so o_ref stays resident
    in VMEM as the running residual stream while each layer's stacked weights
    are streamed by the BlockSpec pipeline once per batch chunk.
    """
    layer = pl.program_id(1)

    @pl.when(layer == 0)
    def _():
        o_ref[...] = x_ref[...]                      # residual stream <- embeddings

    bc, T, C = o_ref.shape
    H = n_head
    hd = C // H
    N = bc * T
    scale = 1.0 / math.sqrt(hd)

    x = o_ref[...].reshape(N, C)                     # (N, C) f32, VMEM-resident

    # Causal mask, computed once per grid step, broadcast over (bc*H).
    row = lax.broadcasted_iota(jnp.int32, (T, T), 0)
    col = lax.broadcasted_iota(jnp.int32, (T, T), 1)
    causal = (col <= row)[None, :, :]

    # ---- attention branch (pre-LN) -----------------------------------------
    h = _layernorm(x, ln1w_ref[0], ln1b_ref[0])
    qkv = jnp.dot(h.astype(jnp.bfloat16), wqkv_ref[0],
                  preferred_element_type=jnp.float32) + bqkv_ref[0]   # (N, 3C)

    def split_heads(m):                              # (N, C) f32 -> (bc*H, T, hd)
        return m.reshape(bc, T, H, hd).swapaxes(1, 2).reshape(bc * H, T, hd)

    # Fold 1/sqrt(hd) into q (cheap (N, C) vmul) instead of scaling the
    # (bc*H, T, T) f32 score tensor.
    q3 = split_heads(qkv[:, 0:C] * scale).astype(jnp.bfloat16)
    k3 = split_heads(qkv[:, C:2 * C]).astype(jnp.bfloat16)
    v3 = split_heads(qkv[:, 2 * C:3 * C]).astype(jnp.bfloat16)

    # Head-batched contractions (no per-head K=hd matmuls, no concatenate of
    # hd-wide lane slices).
    s = jnp.einsum("bqd,bkd->bqk", q3, k3,
                   preferred_element_type=jnp.float32)                # (bc*H,T,T)
    s = jnp.where(causal, s, -1e30)
    s = s - jnp.max(s, axis=-1, keepdims=True)
    p = jnp.exp(s)
    p = p * pl.reciprocal(jnp.sum(p, axis=-1, keepdims=True), approx=True)
    y3 = jnp.einsum("bqk,bkd->bqd", p.astype(jnp.bfloat16), v3,
                    preferred_element_type=jnp.float32)               # (bc*H,T,hd)

    y = y3.reshape(bc, H, T, hd).swapaxes(1, 2).reshape(N, C)         # merge heads
    attn = jnp.dot(y.astype(jnp.bfloat16), wproj_ref[0],
                   preferred_element_type=jnp.float32) + bproj_ref[0]
    x = x + attn

    # ---- MLP branch (pre-LN) ------------------------------------------------
    # TODO(synk): for v7x (64 MiB VMEM) at C>=1024, chunk the 4C hidden dim of
    # w_fc/w_fc2 with an inner pipeline instead of resident per-layer weights.
    h2 = _layernorm(x, ln2w_ref[0], ln2b_ref[0])
    ff = jnp.dot(h2.astype(jnp.bfloat16), wfc_ref[0],
                 preferred_element_type=jnp.float32) + bfc_ref[0]     # (N, 4C)
    ff = _gelu_exact_kernel(ff)
    ff = jnp.dot(ff.astype(jnp.bfloat16), wfc2_ref[0],
                 preferred_element_type=jnp.float32) + bfc2_ref[0]    # (N, C)
    o_ref[...] = (x + ff).reshape(bc, T, C)


def lm_head_kernel(x_ref, lnfw_ref, lnfb_ref, wte_ref, o_ref):
    """Final LayerNorm + tied lm_head on last-token activations; one vocab tile."""
    h = _layernorm(x_ref[...], lnfw_ref[...], lnfb_ref[...])          # (B, C) f32
    # logits_tile = h @ wte_tile.T (transposed contraction, no wte.T in HBM)
    o_ref[...] = lax.dot_general(h.astype(jnp.bfloat16), wte_ref[...],
                                 (((1,), (1,)), ((), ())),
                                 preferred_element_type=jnp.float32)  # (B, TILE_V)


# ----------------------------------------------------------------------------
# Parameter preparation / sizing helpers
# ----------------------------------------------------------------------------
def prepare_params(params):
    """Stack per-layer weights along a leading layer axis; cast matmul weights
    to bfloat16 (MXU-native); pad the tied lm_head weight to a lane-dense tile
    multiple.  LN params / biases / embedding gather stay f32."""
    def stack(name, dtype):
        return jnp.stack([blk[name] for blk in params["blocks"]], axis=0).astype(dtype)

    wte = params["wte"].astype(jnp.float32)
    V, C = wte.shape
    vp = ((V + _LM_TILE_V - 1) // _LM_TILE_V) * _LM_TILE_V
    wte_bf16 = jnp.pad(params["wte"].astype(jnp.bfloat16), ((0, vp - V), (0, 0)))

    return {
        "wte": wte,                                   # gather path (f32)
        "wte_bf16": wte_bf16,                         # tied lm_head, padded to vp
        "wpe": params["wpe"].astype(jnp.float32),
        "lnf_w": params["lnf_w"].astype(jnp.float32),
        "lnf_b": params["lnf_b"].astype(jnp.float32),
        "ln1_w": stack("ln1_w", jnp.float32),
        "ln1_b": stack("ln1_b", jnp.float32),
        "w_qkv": stack("w_qkv", jnp.bfloat16),
        "b_qkv": stack("b_qkv", jnp.float32),
        "w_proj": stack("w_proj", jnp.bfloat16),
        "b_proj": stack("b_proj", jnp.float32),
        "ln2_w": stack("ln2_w", jnp.float32),
        "ln2_b": stack("ln2_b", jnp.float32),
        "w_fc": stack("w_fc", jnp.bfloat16),
        "b_fc": stack("b_fc", jnp.float32),
        "w_fc2": stack("w_fc2", jnp.bfloat16),
        "b_fc2": stack("b_fc2", jnp.float32),
        "n_layer": len(params["blocks"]),
    }


def _pick_batch_chunk(B, T, C, budget_bytes=16 << 20):
    """Largest divisor of B whose (Bc, T, C) f32 activation chunk fits budget."""
    bc = 1
    for cand in range(1, B + 1):
        if B % cand == 0 and cand * T * C * 4 <= budget_bytes:
            bc = cand
    return bc


def _clamp_vmem(estimate_bytes):
    return int(min(128 * 1024 * 1024, max(64 * 1024 * 1024, int(estimate_bytes))))


# ----------------------------------------------------------------------------
# Wrapper (GPT.forward, inference path: targets=None, dropout=0, no kv_cache)
# ----------------------------------------------------------------------------
def gpt_forward_pallas(idx, sp, *, n_head):
    wte = sp["wte"]                       # (V, C), tied with lm_head
    wpe = sp["wpe"]                       # (block_size, C)
    B, T = idx.shape
    V, C = wte.shape
    L = sp["n_layer"]

    # TODO(synk): token/position embedding gather, the (p=0 -> identity) dropout
    # and the kv_cache generation path stay in plain JAX.
    pos = jnp.arange(T, dtype=jnp.int32)
    x = (jnp.take(wte, idx, axis=0) + jnp.take(wpe, pos, axis=0)).astype(jnp.float32)

    bc = _pick_batch_chunk(B, T, C)       # batch chunk per weight stream
    nb = B // bc

    def wspec(shape):                     # stacked layer weights, indexed by layer
        return pl.BlockSpec((1,) + shape, lambda b, l: (l, 0, 0))

    # VMEM budget: double-buffered per-layer bf16 weights + resident activation
    # chunk + f32 intermediates (qkv / ff / per-head scores), with slack.
    per_layer_w = (C * 3 * C + C * C + C * 4 * C + 4 * C * C) * 2 + 14 * C * 4
    intermediates = bc * T * (3 * C + 4 * C + 4 * C) * 4 + bc * n_head * T * T * 8
    blocks_vmem = _clamp_vmem(3 * per_layer_w + 4 * bc * T * C * 4 + intermediates)

    blocks_call = pl.pallas_call(
        functools.partial(gpt_blocks_kernel, n_head=n_head),
        out_shape=jax.ShapeDtypeStruct((B, T, C), jnp.float32),
        grid=(nb, L),
        in_specs=[
            pl.BlockSpec((bc, T, C), lambda b, l: (b, 0, 0)),   # x (read at l==0)
            wspec((1, C)), wspec((1, C)),                       # ln1
            wspec((C, 3 * C)), wspec((1, 3 * C)),               # qkv   (bf16 / f32)
            wspec((C, C)), wspec((1, C)),                       # proj
            wspec((1, C)), wspec((1, C)),                       # ln2
            wspec((C, 4 * C)), wspec((1, 4 * C)),               # fc
            wspec((4 * C, C)), wspec((1, C)),                   # fc2
        ],
        out_specs=pl.BlockSpec((bc, T, C), lambda b, l: (b, 0, 0)),
        compiler_params=pltpu.CompilerParams(
            dimension_semantics=("parallel", "arbitrary"),
            vmem_limit_bytes=blocks_vmem),
    )

    x = blocks_call(x,
                    sp["ln1_w"], sp["ln1_b"],
                    sp["w_qkv"], sp["b_qkv"],
                    sp["w_proj"], sp["b_proj"],
                    sp["ln2_w"], sp["ln2_b"],
                    sp["w_fc"], sp["b_fc"],
                    sp["w_fc2"], sp["b_fc2"])

    # targets is None -> ln_f + tied lm_head on the last token only.
    x_last = x[:, -1, :]                                       # (B, C)
    wte_b = sp["wte_bf16"]                                     # (Vp, C), zero-padded
    Vp = wte_b.shape[0]
    tile_v = min(_LM_TILE_V, Vp)
    n_tiles = Vp // tile_v

    wte_spec_kwargs = {}
    if n_tiles >= 3:
        # HBM-bound weight stream: keep the DMA queue ahead of the skinny matmul.
        wte_spec_kwargs["pipeline_mode"] = pl.Buffered(3)
    wte_spec = pl.BlockSpec((tile_v, C), lambda v: (v, 0), **wte_spec_kwargs)

    lm_vmem = _clamp_vmem(4 * tile_v * C * 2 + 4 * B * tile_v * 4 + 4 * B * C * 4)

    logits = pl.pallas_call(
        lm_head_kernel,
        out_shape=jax.ShapeDtypeStruct((B, Vp), jnp.float32),
        grid=(n_tiles,),
        in_specs=[
            pl.BlockSpec((B, C), lambda v: (0, 0)),            # x_last
            pl.BlockSpec((1, C), lambda v: (0, 0)),            # lnf_w
            pl.BlockSpec((1, C), lambda v: (0, 0)),            # lnf_b
            wte_spec,                                           # wte tile (bf16)
        ],
        out_specs=pl.BlockSpec((B, tile_v), lambda v: (0, v)),
        compiler_params=pltpu.CompilerParams(
            dimension_semantics=("parallel",),
            vmem_limit_bytes=lm_vmem),
    )(x_last, sp["lnf_w"], sp["lnf_b"], wte_b)                 # (B, Vp)
    return logits[:, None, :V]                                 # (B, 1, V)


# ----------------------------------------------------------------------------
# Pure-JAX f32 reference (for correctness check)
# ----------------------------------------------------------------------------
def gpt_forward_ref(idx, params, *, n_head):
    wte, wpe = params["wte"], params["wpe"]
    B, T = idx.shape
    C = wte.shape[1]
    hd = C // n_head
    x = jnp.take(wte, idx, axis=0) + wpe[:T][None]

    row = lax.broadcasted_iota(jnp.int32, (T, T), 0)
    col = lax.broadcasted_iota(jnp.int32, (T, T), 1)
    causal = col <= row

    for lp in params["blocks"]:
        h = _layernorm(x, lp["ln1_w"], lp["ln1_b"])
        qkv = h @ lp["w_qkv"] + lp["b_qkv"]
        q, k, v = jnp.split(qkv, 3, axis=-1)
        q = q.reshape(B, T, n_head, hd).transpose(0, 2, 1, 3)
        k = k.reshape(B, T, n_head, hd).transpose(0, 2, 1, 3)
        v = v.reshape(B, T, n_head, hd).transpose(0, 2, 1, 3)
        s = jnp.einsum("bhqd,bhkd->bhqk", q, k) / math.sqrt(hd)
        s = jnp.where(causal[None, None], s, -jnp.inf)
        p = jax.nn.softmax(s, axis=-1)
        y = jnp.einsum("bhqk,bhkd->bhqd", p, v)
        y = y.transpose(0, 2, 1, 3).reshape(B, T, C)
        x = x + y @ lp["w_proj"] + lp["b_proj"]
        h2 = _layernorm(x, lp["ln2_w"], lp["ln2_b"])
        ff = _gelu_exact_ref(h2 @ lp["w_fc"] + lp["b_fc"])
        x = x + ff @ lp["w_fc2"] + lp["b_fc2"]

    x = _layernorm(x, params["lnf_w"], params["lnf_b"])
    return (x[:, -1, :] @ wte.T)[:, None, :]


# ----------------------------------------------------------------------------
# Deterministic parameter init (nn.Linear weights stored pre-transposed to
# (in, out) so kernels compute x @ W + b).
# ----------------------------------------------------------------------------
def init_params(key, *, vocab_size, block_size, n_layer, n_embd):
    C = n_embd
    std = 0.02
    keys = jax.random.split(key, 2 + 8 * n_layer)
    params = {
        "wte": jax.random.normal(keys[0], (vocab_size, C), jnp.float32) * std,
        "wpe": jax.random.normal(keys[1], (block_size, C), jnp.float32) * std,
        "lnf_w": jnp.ones((1, C), jnp.float32),
        "lnf_b": jnp.zeros((1, C), jnp.float32),
        "blocks": [],
    }
    for li in range(n_layer):
        k = keys[2 + 8 * li: 2 + 8 * (li + 1)]
        blk = {
            "ln1_w": jnp.ones((1, C), jnp.float32),
            "ln1_b": jnp.zeros((1, C), jnp.float32),
            "w_qkv": jax.random.normal(k[0], (C, 3 * C), jnp.float32) * std,
            "b_qkv": jax.random.normal(k[1], (1, 3 * C), jnp.float32) * std,
            "w_proj": jax.random.normal(k[2], (C, C), jnp.float32) * std,
            "b_proj": jax.random.normal(k[3], (1, C), jnp.float32) * std,
            "ln2_w": jnp.ones((1, C), jnp.float32),
            "ln2_b": jnp.zeros((1, C), jnp.float32),
            "w_fc": jax.random.normal(k[4], (C, 4 * C), jnp.float32) * std,
            "b_fc": jax.random.normal(k[5], (1, 4 * C), jnp.float32) * std,
            "w_fc2": jax.random.normal(k[6], (4 * C, C), jnp.float32) * std,
            "b_fc2": jax.random.normal(k[7], (1, C), jnp.float32) * std,
        }
        params["blocks"].append(blk)
    return params


# ----------------------------------------------------------------------------
# Main
# ----------------------------------------------------------------------------
if __name__ == "__main__":
    # Small, forward-consistent config: GPTConfig(block_size=32, vocab_size=256,
    # n_layer=2, n_head=4, n_embd=32, dropout=0.0, bias=True, kv_cache=False)
    VOCAB = 256
    BLOCK_SIZE = 32
    N_LAYER = 2
    N_HEAD = 4
    N_EMBD = 32
    B, T = 2, 8

    key = jax.random.PRNGKey(0)
    k_param, k_idx = jax.random.split(key)
    params = init_params(k_param, vocab_size=VOCAB, block_size=BLOCK_SIZE,
                         n_layer=N_LAYER, n_embd=N_EMBD)
    idx = jax.random.randint(k_idx, (B, T), 0, VOCAB, dtype=jnp.int32)

    sp = prepare_params(params)
    logits = gpt_forward_pallas(idx, sp, n_head=N_HEAD)
    logits = jax.block_until_ready(logits)

    ref = jax.block_until_ready(gpt_forward_ref(idx, params, n_head=N_HEAD))
    # bf16 matmul inputs with f32 accumulation -> slightly looser tolerance.
    np.testing.assert_allclose(np.asarray(logits), np.asarray(ref),
                               rtol=2e-2, atol=2e-2)

    assert logits.shape == (B, 1, VOCAB)
    print("KERNEL_OK")
</pallas_src>

<mosaic_0001>
module attributes {stable_mosaic.version = 11 : i64} {
  func.func @gpt_blocks_kernel(%arg0: i32, %arg1: i32, %arg2: memref<2x8x32xf32, #tpu.memory_space<vmem>>, %arg3: memref<1x1x32xf32, #tpu.memory_space<vmem>>, %arg4: memref<1x1x32xf32, #tpu.memory_space<vmem>>, %arg5: memref<1x32x96xbf16, #tpu.memory_space<vmem>>, %arg6: memref<1x1x96xf32, #tpu.memory_space<vmem>>, %arg7: memref<1x32x32xbf16, #tpu.memory_space<vmem>>, %arg8: memref<1x1x32xf32, #tpu.memory_space<vmem>>, %arg9: memref<1x1x32xf32, #tpu.memory_space<vmem>>, %arg10: memref<1x1x32xf32, #tpu.memory_space<vmem>>, %arg11: memref<1x32x128xbf16, #tpu.memory_space<vmem>>, %arg12: memref<1x1x128xf32, #tpu.memory_space<vmem>>, %arg13: memref<1x128x32xbf16, #tpu.memory_space<vmem>>, %arg14: memref<1x1x32xf32, #tpu.memory_space<vmem>>, %arg15: memref<2x8x32xf32, #tpu.memory_space<vmem>>) attributes {dimension_semantics = [#tpu.dimension_semantics<parallel>, #tpu.dimension_semantics<arbitrary>], iteration_bounds = array<i64: 1, 2>, scalar_prefetch = 0 : i64, scratch_operands = 0 : i64, tpu.core_type = #tpu.core_type<tc>, window_params = [{transform_indices = @transform_0, window_bounds = array<i64: 2, 8, 32>}, {transform_indices = @transform_1, window_bounds = array<i64: 1, 1, 32>}, {transform_indices = @transform_2, window_bounds = array<i64: 1, 1, 32>}, {transform_indices = @transform_3, window_bounds = array<i64: 1, 32, 96>}, {transform_indices = @transform_4, window_bounds = array<i64: 1, 1, 96>}, {transform_indices = @transform_5, window_bounds = array<i64: 1, 32, 32>}, {transform_indices = @transform_6, window_bounds = array<i64: 1, 1, 32>}, {transform_indices = @transform_7, window_bounds = array<i64: 1, 1, 32>}, {transform_indices = @transform_8, window_bounds = array<i64: 1, 1, 32>}, {transform_indices = @transform_9, window_bounds = array<i64: 1, 32, 128>}, {transform_indices = @transform_10, window_bounds = array<i64: 1, 1, 128>}, {transform_indices = @transform_11, window_bounds = array<i64: 1, 128, 32>}, {transform_indices = @transform_12, window_bounds = array<i64: 1, 1, 32>}, {transform_indices = @transform_13, window_bounds = array<i64: 2, 8, 32>}]} {
    %c0_i32 = arith.constant 0 : i32
    %0 = arith.cmpi eq, %arg1, %c0_i32 : i32
    %1 = arith.extui %0 : i1 to i32
    %c0_i32_0 = arith.constant 0 : i32
    %2 = arith.cmpi ne, %1, %c0_i32_0 : i32
    scf.if %2 {
      %c0_76 = arith.constant 0 : index
      %c0_77 = arith.constant 0 : index
      %c0_78 = arith.constant 0 : index
      %174 = vector.load %arg2[%c0_76, %c0_77, %c0_78] : memref<2x8x32xf32, #tpu.memory_space<vmem>>, vector<2x8x32xf32>
      %c0_79 = arith.constant 0 : index
      %c0_80 = arith.constant 0 : index
      %c0_81 = arith.constant 0 : index
      %175 = vector.load %arg15[%c0_79, %c0_80, %c0_81] : memref<2x8x32xf32, #tpu.memory_space<vmem>>, vector<2x8x32xf32>
      tpu.vector_store %arg15[%c0_79, %c0_80, %c0_81], %174 {strides = array<i32>} : memref<2x8x32xf32, #tpu.memory_space<vmem>>, vector<2x8x32xf32>,
    } else {
    }
    %c0 = arith.constant 0 : index
    %c0_1 = arith.constant 0 : index
    %c0_2 = arith.constant 0 : index
    %3 = vector.load %arg15[%c0, %c0_1, %c0_2] : memref<2x8x32xf32, #tpu.memory_space<vmem>>, vector<2x8x32xf32>
    %4 = vector.shape_cast %3 : vector<2x8x32xf32> to vector<16x32xf32>
    %5 = tpu.iota {dimensions = array<i32: 0>} : vector<8x8xi32>
    %6 = tpu.iota {dimensions = array<i32: 1>} : vector<8x8xi32>
    %7 = arith.cmpi sle, %6, %5 : vector<8x8xi32>
    %8 = vector.shape_cast %7 : vector<8x8xi1> to vector<1x8x8xi1>
    %c0_3 = arith.constant 0 : index
    %c0_4 = arith.constant 0 : index
    %c0_5 = arith.constant 0 : index
    %9 = vector.load %arg3[%c0_3, %c0_4, %c0_5] : memref<1x1x32xf32, #tpu.memory_space<vmem>>, vector<1x1x32xf32>
    %10 = vector.shape_cast %9 : vector<1x1x32xf32> to vector<1x32xf32>
    %c0_6 = arith.constant 0 : index
    %c0_7 = arith.constant 0 : index
    %c0_8 = arith.constant 0 : index
    %11 = vector.load %arg4[%c0_6, %c0_7, %c0_8] : memref<1x1x32xf32, #tpu.memory_space<vmem>>, vector<1x1x32xf32>
    %12 = vector.shape_cast %11 : vector<1x1x32xf32> to vector<1x32xf32>
    %cst = arith.constant dense<0.000000e+00> : vector<16xf32>
    %13 = vector.multi_reduction <add>, %4, %cst [1] : vector<16x32xf32> to vector<16xf32>
    %14 = vector.shape_cast %13 : vector<16xf32> to vector<16x1xf32>
    %cst_9 = arith.constant 3.200000e+01 : f32
    %15 = vector.broadcast %cst_9 : f32 to vector<16x1xf32>
    %16 = arith.divf %14, %15 : vector<16x1xf32>
    %17 = vector.broadcast %16 : vector<16x1xf32> to vector<16x32xf32>
    %18 = arith.subf %4, %17 : vector<16x32xf32>
    %19 = arith.mulf %18, %18 : vector<16x32xf32>
    %cst_10 = arith.constant dense<0.000000e+00> : vector<16xf32>
    %20 = vector.multi_reduction <add>, %19, %cst_10 [1] : vector<16x32xf32> to vector<16xf32>
    %21 = vector.shape_cast %20 : vector<16xf32> to vector<16x1xf32>
    %cst_11 = arith.constant 3.200000e+01 : f32
    %22 = vector.broadcast %cst_11 : f32 to vector<16x1xf32>
    %23 = arith.divf %21, %22 : vector<16x1xf32>
    %24 = vector.broadcast %16 : vector<16x1xf32> to vector<16x32xf32>
    %25 = arith.subf %4, %24 : vector<16x32xf32>
    %cst_12 = arith.constant 9.99999974E-6 : f32
    %26 = vector.broadcast %cst_12 : f32 to vector<16x1xf32>
    %27 = arith.addf %23, %26 : vector<16x1xf32>
    %28 = math.rsqrt %27 : vector<16x1xf32>
    %29 = vector.broadcast %28 : vector<16x1xf32> to vector<16x32xf32>
    %30 = arith.mulf %25, %29 : vector<16x32xf32>
    %31 = vector.broadcast %10 : vector<1x32xf32> to vector<16x32xf32>
    %32 = arith.mulf %30, %31 : vector<16x32xf32>
    %33 = vector.broadcast %12 : vector<1x32xf32> to vector<16x32xf32>
    %34 = arith.addf %32, %33 : vector<16x32xf32>
    %35 = arith.truncf %34 : vector<16x32xf32> to vector<16x32xbf16>
    %c0_13 = arith.constant 0 : index
    %c0_14 = arith.constant 0 : index
    %c0_15 = arith.constant 0 : index
    %36 = vector.load %arg5[%c0_13, %c0_14, %c0_15] : memref<1x32x96xbf16, #tpu.memory_space<vmem>>, vector<1x32x96xbf16>
    %37 = vector.shape_cast %36 : vector<1x32x96xbf16> to vector<32x96xbf16>
    %cst_16 = arith.constant dense<0.000000e+00> : vector<16x96xf32>
    %38 = tpu.matmul %35, %37, %cst_16 {dimension_numbers = #tpu.dot_dimension_numbers<[1], [0], [0], [1], [0, 0, 1, 1], [], []>} : vector<16x32xbf16>, vector<32x96xbf16>, vector<16x96xf32> -> vector<16x96xf32>
    %c0_17 = arith.constant 0 : index
    %c0_18 = arith.constant 0 : index
    %c0_19 = arith.constant 0 : index
    %39 = vector.load %arg6[%c0_17, %c0_18, %c0_19] : memref<1x1x96xf32, #tpu.memory_space<vmem>>, vector<1x1x96xf32>
    %40 = vector.shape_cast %39 : vector<1x1x96xf32> to vector<1x96xf32>
    %41 = vector.broadcast %40 : vector<1x96xf32> to vector<16x96xf32>
    %42 = arith.addf %38, %41 : vector<16x96xf32>
    %43 = vector.extract_strided_slice %42 {offsets = [0, 0], sizes = [16, 32], strides = [1, 1]} : vector<16x96xf32> to vector<16x32xf32>
    %cst_20 = arith.constant 0.353553385 : f32
    %44 = vector.broadcast %cst_20 : f32 to vector<16x32xf32>
    %45 = arith.mulf %43, %44 : vector<16x32xf32>
    %46 = vector.shape_cast %45 : vector<16x32xf32> to vector<2x8x4x8xf32>
    %47 = tpu.transpose %46, [0, 2, 1, 3] : vector<2x8x4x8xf32> -> vector<2x4x8x8xf32>
    %48 = vector.shape_cast %47 : vector<2x4x8x8xf32> to vector<8x8x8xf32>
    %49 = arith.truncf %48 : vector<8x8x8xf32> to vector<8x8x8xbf16>
    %50 = vector.extract_strided_slice %42 {offsets = [0, 32], sizes = [16, 32], strides = [1, 1]} : vector<16x96xf32> to vector<16x32xf32>
    %51 = vector.shape_cast %50 : vector<16x32xf32> to vector<2x8x4x8xf32>
    %52 = tpu.transpose %51, [0, 2, 1, 3] : vector<2x8x4x8xf32> -> vector<2x4x8x8xf32>
    %53 = vector.shape_cast %52 : vector<2x4x8x8xf32> to vector<8x8x8xf32>
    %54 = arith.truncf %53 : vector<8x8x8xf32> to vector<8x8x8xbf16>
    %55 = vector.extract_strided_slice %42 {offsets = [0, 64], sizes = [16, 32], strides = [1, 1]} : vector<16x96xf32> to vector<16x32xf32>
    %56 = vector.shape_cast %55 : vector<16x32xf32> to vector<2x8x4x8xf32>
    %57 = tpu.transpose %56, [0, 2, 1, 3] : vector<2x8x4x8xf32> -> vector<2x4x8x8xf32>
    %58 = vector.shape_cast %57 : vector<2x4x8x8xf32> to vector<8x8x8xf32>
    %59 = arith.truncf %58 : vector<8x8x8xf32> to vector<8x8x8xbf16>
    "tpu.trace_start"() <{level = 10 : i32, message = "bqd,bkd->bqk"}> : () -> ()
    %cst_21 = arith.constant dense<0.000000e+00> : vector<8x8x8xf32>
    %60 = tpu.matmul %49, %54, %cst_21 {dimension_numbers = #tpu.dot_dimension_numbers<[2], [2], [1], [1], [0, 0, 0, 1, 1, 1], [0], [0]>} : vector<8x8x8xbf16>, vector<8x8x8xbf16>, vector<8x8x8xf32> -> vector<8x8x8xf32>
    %cst_22 = arith.constant -1.000000e+30 : f32
    "tpu.trace_stop"() : () -> ()
    %61 = vector.shape_cast %8 : vector<1x8x8xi1> to vector<1x8x8xi1>
    %62 = vector.broadcast %61 : vector<1x8x8xi1> to vector<8x8x8xi1>
    %63 = vector.broadcast %cst_22 : f32 to vector<8x8x8xf32>
    %64 = arith.select %62, %60, %63 : vector<8x8x8xi1>, vector<8x8x8xf32>
    %cst_23 = arith.constant dense<0xFF800000> : vector<8x8xf32>
    %65 = vector.multi_reduction <maximumf>, %64, %cst_23 [2] : vector<8x8x8xf32> to vector<8x8xf32>
    %66 = vector.shape_cast %65 : vector<8x8xf32> to vector<8x8x1xf32>
    %67 = vector.broadcast %66 : vector<8x8x1xf32> to vector<8x8x8xf32>
    %68 = arith.subf %64, %67 : vector<8x8x8xf32>
    %69 = math.exp %68 : vector<8x8x8xf32>
    %cst_24 = arith.constant dense<0.000000e+00> : vector<8x8xf32>
    %70 = vector.multi_reduction <add>, %69, %cst_24 [2] : vector<8x8x8xf32> to vector<8x8xf32>
    %71 = vector.shape_cast %70 : vector<8x8xf32> to vector<8x8x1xf32>
    %72 = tpu.reciprocal %71 {approx = true} : vector<8x8x1xf32> -> vector<8x8x1xf32>
    %73 = vector.broadcast %72 : vector<8x8x1xf32> to vector<8x8x8xf32>
    %74 = arith.mulf %69, %73 : vector<8x8x8xf32>
    %75 = arith.truncf %74 : vector<8x8x8xf32> to vector<8x8x8xbf16>
    "tpu.trace_start"() <{level = 10 : i32, message = "bqk,bkd->bqd"}> : () -> ()
    %cst_25 = arith.constant dense<0.000000e+00> : vector<8x8x8xf32>
    %76 = tpu.matmul %75, %59, %cst_25 {dimension_numbers = #tpu.dot_dimension_numbers<[2], [1], [1], [2], [0, 0, 0, 1, 1, 2], [0], [0]>} : vector<8x8x8xbf16>, vector<8x8x8xbf16>, vector<8x8x8xf32> -> vector<8x8x8xf32>
    "tpu.trace_stop"() : () -> ()
    %77 = vector.shape_cast %76 : vector<8x8x8xf32> to vector<2x4x8x8xf32>
    %78 = tpu.transpose %77, [0, 2, 1, 3] : vector<2x4x8x8xf32> -> vector<2x8x4x8xf32>
    %79 = vector.shape_cast %78 : vector<2x8x4x8xf32> to vector<16x32xf32>
    %80 = arith.truncf %79 : vector<16x32xf32> to vector<16x32xbf16>
    %c0_26 = arith.constant 0 : index
    %c0_27 = arith.constant 0 : index
    %c0_28 = arith.constant 0 : index
    %81 = vector.load %arg7[%c0_26, %c0_27, %c0_28] : memref<1x32x32xbf16, #tpu.memory_space<vmem>>, vector<1x32x32xbf16>
    %82 = vector.shape_cast %81 : vector<1x32x32xbf16> to vector<32x32xbf16>
    %cst_29 = arith.constant dense<0.000000e+00> : vector<16x32xf32>
    %83 = tpu.matmul %80, %82, %cst_29 {dimension_numbers = #tpu.dot_dimension_numbers<[1], [0], [0], [1], [0, 0, 1, 1], [], []>} : vector<16x32xbf16>, vector<32x32xbf16>, vector<16x32xf32> -> vector<16x32xf32>
    %c0_30 = arith.constant 0 : index
    %c0_31 = arith.constant 0 : index
    %c0_32 = arith.constant 0 : index
    %84 = vector.load %arg8[%c0_30, %c0_31, %c0_32] : memref<1x1x32xf32, #tpu.memory_space<vmem>>, vector<1x1x32xf32>
    %85 = vector.shape_cast %84 : vector<1x1x32xf32> to vector<1x32xf32>
    %86 = vector.broadcast %85 : vector<1x32xf32> to vector<16x32xf32>
    %87 = arith.addf %83, %86 : vector<16x32xf32>
    %88 = arith.addf %4, %87 : vector<16x32xf32>
    %c0_33 = arith.constant 0 : index
    %c0_34 = arith.constant 0 : index
    %c0_35 = arith.constant 0 : index
    %89 = vector.load %arg9[%c0_33, %c0_34, %c0_35] : memref<1x1x32xf32, #tpu.memory_space<vmem>>, vector<1x1x32xf32>
    %90 = vector.shape_cast %89 : vector<1x1x32xf32> to vector<1x32xf32>
    %c0_36 = arith.constant 0 : index
    %c0_37 = arith.constant 0 : index
    %c0_38 = arith.constant 0 : index
    %91 = vector.load %arg10[%c0_36, %c0_37, %c0_38] : memref<1x1x32xf32, #tpu.memory_space<vmem>>, vector<1x1x32xf32>
    %92 = vector.shape_cast %91 : vector<1x1x32xf32> to vector<1x32xf32>
    %cst_39 = arith.constant dense<0.000000e+00> : vector<16xf32>
    %93 = vector.multi_reduction <add>, %88, %cst_39 [1] : vector<16x32xf32> to vector<16xf32>
    %94 = vector.shape_cast %93 : vector<16xf32> to vector<16x1xf32>
    %cst_40 = arith.constant 3.200000e+01 : f32
    %95 = vector.broadcast %cst_40 : f32 to vector<16x1xf32>
    %96 = arith.divf %94, %95 : vector<16x1xf32>
    %97 = vector.broadcast %96 : vector<16x1xf32> to vector<16x32xf32>
    %98 = arith.subf %88, %97 : vector<16x32xf32>
    %99 = arith.mulf %98, %98 : vector<16x32xf32>
    %cst_41 = arith.constant dense<0.000000e+00> : vector<16xf32>
    %100 = vector.multi_reduction <add>, %99, %cst_41 [1] : vector<16x32xf32> to vector<16xf32>
    %101 = vector.shape_cast %100 : vector<16xf32> to vector<16x1xf32>
    %cst_42 = arith.constant 3.200000e+01 : f32
    %102 = vector.broadcast %cst_42 : f32 to vector<16x1xf32>
    %103 = arith.divf %101, %102 : vector<16x1xf32>
    %104 = vector.broadcast %96 : vector<16x1xf32> to vector<16x32xf32>
    %105 = arith.subf %88, %104 : vector<16x32xf32>
    %cst_43 = arith.constant 9.99999974E-6 : f32
    %106 = vector.broadcast %cst_43 : f32 to vector<16x1xf32>
    %107 = arith.addf %103, %106 : vector<16x1xf32>
    %108 = math.rsqrt %107 : vector<16x1xf32>
    %109 = vector.broadcast %108 : vector<16x1xf32> to vector<16x32xf32>
    %110 = arith.mulf %105, %109 : vector<16x32xf32>
    %111 = vector.broadcast %90 : vector<1x32xf32> to vector<16x32xf32>
    %112 = arith.mulf %110, %111 : vector<16x32xf32>
    %113 = vector.broadcast %92 : vector<1x32xf32> to vector<16x32xf32>
    %114 = arith.addf %112, %113 : vector<16x32xf32>
    %115 = arith.truncf %114 : vector<16x32xf32> to vector<16x32xbf16>
    %c0_44 = arith.constant 0 : index
    %c0_45 = arith.constant 0 : index
    %c0_46 = arith.constant 0 : index
    %116 = vector.load %arg11[%c0_44, %c0_45, %c0_46] : memref<1x32x128xbf16, #tpu.memory_space<vmem>>, vector<1x32x128xbf16>
    %117 = vector.shape_cast %116 : vector<1x32x128xbf16> to vector<32x128xbf16>
    %cst_47 = arith.constant dense<0.000000e+00> : vector<16x128xf32>
    %118 = tpu.matmul %115, %117, %cst_47 {dimension_numbers = #tpu.dot_dimension_numbers<[1], [0], [0], [1], [0, 0, 1, 1], [], []>} : vector<16x32xbf16>, vector<32x128xbf16>, vector<16x128xf32> -> vector<16x128xf32>
    %c0_48 = arith.constant 0 : index
    %c0_49 = arith.constant 0 : index
    %c0_50 = arith.constant 0 : index
    %119 = vector.load %arg12[%c0_48, %c0_49, %c0_50] : memref<1x1x128xf32, #tpu.memory_space<vmem>>, vector<1x1x128xf32>
    %120 = vector.shape_cast %119 : vector<1x1x128xf32> to vector<1x128xf32>
    %121 = vector.broadcast %120 : vector<1x128xf32> to vector<16x128xf32>
    %122 = arith.addf %118, %121 : vector<16x128xf32>
    %cst_51 = arith.constant 5.000000e-01 : f32
    %123 = vector.broadcast %cst_51 : f32 to vector<16x128xf32>
    %124 = arith.mulf %123, %122 : vector<16x128xf32>
    %cst_52 = arith.constant 0.707106769 : f32
    %125 = vector.broadcast %cst_52 : f32 to vector<16x128xf32>
    %126 = arith.mulf %122, %125 : vector<16x128xf32>
    %127 = math.absf %126 : vector<16x128xf32>
    %cst_53 = arith.constant 0.327591091 : f32
    %128 = vector.broadcast %cst_53 : f32 to vector<16x128xf32>
    %129 = arith.mulf %128, %127 : vector<16x128xf32>
    %cst_54 = arith.constant 1.000000e+00 : f32
    %130 = vector.broadcast %cst_54 : f32 to vector<16x128xf32>
    %131 = arith.addf %130, %129 : vector<16x128xf32>
    %cst_55 = arith.constant 1.000000e+00 : f32
    %132 = vector.broadcast %cst_55 : f32 to vector<16x128xf32>
    %133 = arith.divf %132, %131 : vector<16x128xf32>
    %cst_56 = arith.constant 1.06140542 : f32
    %134 = vector.broadcast %cst_56 : f32 to vector<16x128xf32>
    %135 = arith.mulf %134, %133 : vector<16x128xf32>
    %cst_57 = arith.constant -1.45315206 : f32
    %136 = vector.broadcast %cst_57 : f32 to vector<16x128xf32>
    %137 = arith.addf %135, %136 : vector<16x128xf32>
    %138 = arith.mulf %137, %133 : vector<16x128xf32>
    %cst_58 = arith.constant 1.42141378 : f32
    %139 = vector.broadcast %cst_58 : f32 to vector<16x128xf32>
    %140 = arith.addf %138, %139 : vector<16x128xf32>
    %141 = arith.mulf %140, %133 : vector<16x128xf32>
    %cst_59 = arith.constant -0.284496725 : f32
    %142 = vector.broadcast %cst_59 : f32 to vector<16x128xf32>
    %143 = arith.addf %141, %142 : vector<16x128xf32>
    %144 = arith.mulf %143, %133 : vector<16x128xf32>
    %cst_60 = arith.constant 0.254829586 : f32
    %145 = vector.broadcast %cst_60 : f32 to vector<16x128xf32>
    %146 = arith.addf %144, %145 : vector<16x128xf32>
    %147 = arith.mulf %146, %133 : vector<16x128xf32>
    %148 = arith.mulf %127, %127 : vector<16x128xf32>
    %cst_61 = arith.constant 0.000000e+00 : f32
    %149 = vector.broadcast %cst_61 : f32 to vector<16x128xf32>
    %150 = arith.subf %149, %148 : vector<16x128xf32>
    %151 = math.exp %150 : vector<16x128xf32>
    %152 = arith.mulf %147, %151 : vector<16x128xf32>
    %cst_62 = arith.constant 1.000000e+00 : f32
    %153 = vector.broadcast %cst_62 : f32 to vector<16x128xf32>
    %154 = arith.subf %153, %152 : vector<16x128xf32>
    %cst_63 = arith.constant 0.000000e+00 : f32
    %155 = vector.broadcast %cst_63 : f32 to vector<16x128xf32>
    %156 = arith.cmpf olt, %126, %155 : vector<16x128xf32>
    %cst_64 = arith.constant 0.000000e+00 : f32
    %157 = vector.broadcast %cst_64 : f32 to vector<16x128xf32>
    %158 = arith.subf %157, %154 : vector<16x128xf32>
    %159 = arith.select %156, %158, %154 : vector<16x128xi1>, vector<16x128xf32>
    %cst_65 = arith.constant 1.000000e+00 : f32
    %160 = vector.broadcast %cst_65 : f32 to vector<16x128xf32>
    %161 = arith.addf %160, %159 : vector<16x128xf32>
    %162 = arith.mulf %124, %161 : vector<16x128xf32>
    %163 = arith.truncf %162 : vector<16x128xf32> to vector<16x128xbf16>
    %c0_66 = arith.constant 0 : index
    %c0_67 = arith.constant 0 : index
    %c0_68 = arith.constant 0 : index
    %164 = vector.load %arg13[%c0_66, %c0_67, %c0_68] : memref<1x128x32xbf16, #tpu.memory_space<vmem>>, vector<1x128x32xbf16>
    %165 = vector.shape_cast %164 : vector<1x128x32xbf16> to vector<128x32xbf16>
    %cst_69 = arith.constant dense<0.000000e+00> : vector<16x32xf32>
    %166 = tpu.matmul %163, %165, %cst_69 {dimension_numbers = #tpu.dot_dimension_numbers<[1], [0], [0], [1], [0, 0, 1, 1], [], []>} : vector<16x128xbf16>, vector<128x32xbf16>, vector<16x32xf32> -> vector<16x32xf32>
    %c0_70 = arith.constant 0 : index
    %c0_71 = arith.constant 0 : index
    %c0_72 = arith.constant 0 : index
    %167 = vector.load %arg14[%c0_70, %c0_71, %c0_72] : memref<1x1x32xf32, #tpu.memory_space<vmem>>, vector<1x1x32xf32>
    %168 = vector.shape_cast %167 : vector<1x1x32xf32> to vector<1x32xf32>
    %169 = vector.broadcast %168 : vector<1x32xf32> to vector<16x32xf32>
    %170 = arith.addf %166, %169 : vector<16x32xf32>
    %171 = arith.addf %88, %170 : vector<16x32xf32>
    %172 = vector.shape_cast %171 : vector<16x32xf32> to vector<2x8x32xf32>
    %c0_73 = arith.constant 0 : index
    %c0_74 = arith.constant 0 : index
    %c0_75 = arith.constant 0 : index
    %173 = vector.load %arg15[%c0_73, %c0_74, %c0_75] : memref<2x8x32xf32, #tpu.memory_space<vmem>>, vector<2x8x32xf32>
    tpu.vector_store %arg15[%c0_73, %c0_74, %c0_75], %172 {strides = array<i32>} : memref<2x8x32xf32, #tpu.memory_space<vmem>>, vector<2x8x32xf32>,
    return
  }
  func.func @transform_0(%arg0: i32, %arg1: i32) -> (i32, i32, i32) {
    %c0_i32 = arith.constant 0 : i32
    %c0_i32_0 = arith.constant 0 : i32
    %c0_i32_1 = arith.constant 0 : i32
    return %arg0, %c0_i32, %c0_i32_0 : i32, i32, i32
  }
  func.func @transform_1(%arg0: i32, %arg1: i32) -> (i32, i32, i32) {
    %c0_i32 = arith.constant 0 : i32
    %c0_i32_0 = arith.constant 0 : i32
    %c0_i32_1 = arith.constant 0 : i32
    return %arg1, %c0_i32, %c0_i32_0 : i32, i32, i32
  }
  func.func @transform_2(%arg0: i32, %arg1: i32) -> (i32, i32, i32) {
    %c0_i32 = arith.constant 0 : i32
    %c0_i32_0 = arith.constant 0 : i32
    %c0_i32_1 = arith.constant 0 : i32
    return %arg1, %c0_i32, %c0_i32_0 : i32, i32, i32
  }
  func.func @transform_3(%arg0: i32, %arg1: i32) -> (i32, i32, i32) {
    %c0_i32 = arith.constant 0 : i32
    %c0_i32_0 = arith.constant 0 : i32
    %c0_i32_1 = arith.constant 0 : i32
    return %arg1, %c0_i32, %c0_i32_0 : i32, i32, i32
  }
  func.func @transform_4(%arg0: i32, %arg1: i32) -> (i32, i32, i32) {
    %c0_i32 = arith.constant 0 : i32
    %c0_i32_0 = arith.constant 0 : i32
    %c0_i32_1 = arith.constant 0 : i32
    return %arg1, %c0_i32, %c0_i32_0 : i32, i32, i32
  }
  func.func @transform_5(%arg0: i32, %arg1: i32) -> (i32, i32, i32) {
    %c0_i32 = arith.constant 0 : i32
    %c0_i32_0 = arith.constant 0 : i32
    %c0_i32_1 = arith.constant 0 : i32
    return %arg1, %c0_i32, %c0_i32_0 : i32, i32, i32
  }
  func.func @transform_6(%arg0: i32, %arg1: i32) -> (i32, i32, i32) {
    %c0_i32 = arith.constant 0 : i32
    %c0_i32_0 = arith.constant 0 : i32
    %c0_i32_1 = arith.constant 0 : i32
    return %arg1, %c0_i32, %c0_i32_0 : i32, i32, i32
  }
  func.func @transform_7(%arg0: i32, %arg1: i32) -> (i32, i32, i32) {
    %c0_i32 = arith.constant 0 : i32
    %c0_i32_0 = arith.constant 0 : i32
    %c0_i32_1 = arith.constant 0 : i32
    return %arg1, %c0_i32, %c0_i32_0 : i32, i32, i32
  }
  func.func @transform_8(%arg0: i32, %arg1: i32) -> (i32, i32, i32) {
    %c0_i32 = arith.constant 0 : i32
    %c0_i32_0 = arith.constant 0 : i32
    %c0_i32_1 = arith.constant 0 : i32
    return %arg1, %c0_i32, %c0_i32_0 : i32, i32, i32
  }
  func.func @transform_9(%arg0: i32, %arg1: i32) -> (i32, i32, i32) {
    %c0_i32 = arith.constant 0 : i32
    %c0_i32_0 = arith.constant 0 : i32
    %c0_i32_1 = arith.constant 0 : i32
    return %arg1, %c0_i32, %c0_i32_0 : i32, i32, i32
  }
  func.func @transform_10(%arg0: i32, %arg1: i32) -> (i32, i32, i32) {
    %c0_i32 = arith.constant 0 : i32
    %c0_i32_0 = arith.constant 0 : i32
    %c0_i32_1 = arith.constant 0 : i32
    return %arg1, %c0_i32, %c0_i32_0 : i32, i32, i32
  }
  func.func @transform_11(%arg0: i32, %arg1: i32) -> (i32, i32, i32) {
    %c0_i32 = arith.constant 0 : i32
    %c0_i32_0 = arith.constant 0 : i32
    %c0_i32_1 = arith.constant 0 : i32
    return %arg1, %c0_i32, %c0_i32_0 : i32, i32, i32
  }
  func.func @transform_12(%arg0: i32, %arg1: i32) -> (i32, i32, i32) {
    %c0_i32 = arith.constant 0 : i32
    %c0_i32_0 = arith.constant 0 : i32
    %c0_i32_1 = arith.constant 0 : i32
    return %arg1, %c0_i32, %c0_i32_0 : i32, i32, i32
  }
  func.func @transform_13(%arg0: i32, %arg1: i32) -> (i32, i32, i32) {
    %c0_i32 = arith.constant 0 : i32
    %c0_i32_0 = arith.constant 0 : i32
    %c0_i32_1 = arith.constant 0 : i32
    return %arg0, %c0_i32, %c0_i32_0 : i32, i32, i32
  }
}

</mosaic_0001>

<bundles_post_ra>
// kernel: tpu_custom_call.1
= control target key start
LH: loop header
LB: loop body
LE: loop exit
PB: predicated region body
PF: predicated region fallthrough
CT: control target
= control target key end

     0   :  { %s5902_s0 = inlined_call_operand.hbm [shape: f32[2,8,32], index: 0, kind: input, shape index: {}]   ;;  %s5903_s1 = inlined_call_operand.hbm [shape: f32[2,1,32], index: 1, kind: input, shape index: {}]   ;;  %s5904_s2 = inlined_call_operand.hbm [shape: f32[2,1,32], index: 2, kind: input, shape index: {}]   ;;  %s5905_s3 = inlined_call_operand.hbm [shape: bf16[2,32,96], index: 3, kind: input, shape index: {}]   ;;  %s5906_s4 = inlined_call_operand.hbm [shape: f32[2,1,96], index: 4, kind: input, shape index: {}]   ;;  %s5907_s5 = inlined_call_operand.hbm [shape: bf16[2,32,32], index: 5, kind: input, shape index: {}]   ;;  %s5908_s6 = inlined_call_operand.hbm [shape: f32[2,1,32], index: 6, kind: input, shape index: {}]   ;;  %s5909_s7 = inlined_call_operand.hbm [shape: f32[2,1,32], index: 7, kind: input, shape index: {}]   ;;  %s5910_s8 = inlined_call_operand.hbm [shape: f32[2,1,32], index: 8, kind: input, shape index: {}]   ;;  %s5911_s9 = inlined_call_operand.hbm [shape: bf16[2,32,128], index: 9, kind: input, shape index: {}]   ;;  %s5912_s10 = inlined_call_operand.hbm [shape: f32[2,1,128], index: 10, kind: input, shape index: {}]   ;;  %s5913_s11 = inlined_call_operand.hbm [shape: bf16[2,128,32], index: 11, kind: input, shape index: {}]   ;;  %s5914_s12 = inlined_call_operand.hbm [shape: f32[2,1,32], index: 12, kind: input, shape index: {}]   ;;  %s5915_s13 = inlined_call_operand.hbm [shape: f32[2,8,32], index: 13, kind: output, shape index: {}]  }
   0x1   :  { %5937 = sst [smem:[#allocation36_spill]] %s5902_s0 }
   0x2   :  { %5938 = sst [smem:[#allocation37_spill]] %s5903_s1 }
   0x3   :  { %5939 = sst [smem:[#allocation38_spill]] %s5905_s3 }
   0x4   :  { %5940 = sst [smem:[#allocation39_spill]] %s5907_s5 }
   0x5   :  { %5941 = sst [smem:[#allocation40_spill]] %s5909_s7 }
   0x6   :  { %5942 = sst [smem:[#allocation41_spill]] %s5910_s8 }
   0x7   :  { %5943 = sst [smem:[#allocation42_spill]] %s5912_s10 }
   0x8   :  { %5944 = sst [smem:[#allocation43_spill]] %s5914_s12 }
   0x9   :  { %5945 = sst [smem:[#allocation44_spill]] %s5915_s13 }
   0xa   :  { %18 = vsyncpa [#allocation3], 0 }
   0xb   :  { %19 = vsyncpa [#allocation6], 0 }
   0xc   :  { %21 = vsyncpa [#allocation6 + $0x1], 0 }
   0xd   :  { %22 = vsyncpa [#allocation9], 0 }
   0xe   :  { %24 = vsyncpa [#allocation9 + $0x1], 0 }
   0xf   :  { %25 = vsyncpa [#allocation12], 0 }
  0x10   :  { %27 = vsyncpa [#allocation12 + $0x1], 0 }
  0x11   :  { %28 = vsyncpa [#allocation15], 0 }
  0x12   :  { %30 = vsyncpa [#allocation15 + $0x1], 0 }
  0x13   :  { %31 = vsyncpa [#allocation18], 0 }
  0x14   :  { %33 = vsyncpa [#allocation18 + $0x1], 0 }
  0x15   :  { %34 = vsyncpa [#allocation21], 0 }
  0x16   :  { %36 = vsyncpa [#allocation21 + $0x1], 0 }
  0x17   :  { %37 = vsyncpa [#allocation4], 0  ;;  %s4822_s25 = smov 0   ;;  %s4824_s26 = smov 0  }
  0x18   :  { %s4826_s27 = smov 0   ;;  %s4828_s28 = smov 0  }
  0x19   :  { %s4830_s29 = smov 0   ;;  %s4832_s30 = smov 0  }
  0x1a LB: > { %5946 = sst [smem:[#allocation32_spill]] %s4707_s27  ;;  %s52_s14 = sadd.s32 1, %s4715_s29  ;;  %s4719_s30 = sphi %s4832_s30, %s43_s30   ;;  %s4715_s29 = sphi %s4830_s29, %s5996_s29   ;;  %s4711_s28 = sphi %s4828_s28, %s5995_s28   ;;  %s4707_s27 = sphi %s4826_s27, %s5991_s27   ;;  %s4703_s26 = sphi %s4824_s26, %s5994_s26   ;;  %s4699_s25 = sphi %s4822_s25, %s5993_s25  }
  0x1b   : > { %5947 = sst [smem:[#allocation33_spill]] %s4711_s28  ;;  %s88_s15 = sadd.s32 1, %s4707_s27 }
  0x1c   : > { %p53_p0 = scmp.ge.s32.totalorder %s52_s14, 2  ;;  %p95_p1 = scmp.ne.s32.totalorder %s4707_s27, %s4703_s26 }
  0x1d   : > { %p96_p2 = scmp.eq.s32.totalorder %s4719_s30, 0  ;;  %p4077_p4 = scmp.lt.s32.totalorder %s4719_s30, 2 }
  0x1e   : > { %s5998_s14 = smov (%p53_p0, %s52_s14), 0  ;;  %s4863_s17 = sand.u32 1, %s4719_s30  }
  0x1f   : > { %5948 = sst [smem:[#allocation34_spill]] %s5998_s14  ;;  %p97_p3 = por %p96_p2, %p95_p1 }
  0x20   : > { %s85_s16 = ssub.s32 %s4715_s29, %s5998_s14  ;;  %s4866_s18 = sand.u32 1, %s4707_s27  }
  0x21   : > { %p86_p5 = scmp.eq.s32.totalorder %s85_s16, 0  ;;  %s4869_s19 = sshll.u32 %s4715_s29, 4 }
  0x22   : > { %s5950_s1 = sld [smem:[#allocation37_spill]]  ;;  %s456_s24 = scalar_lea.vmem [#allocation5], %s4866_s18 }
  0x23   : > { %s4872_s20 = scalar_select %p86_p5, %s4707_s27, %s88_s15  }
  0x24   : > { %s463_s16 = sshll.u32 %s456_s24, 4  ;;  %p4881_p6 = pnand %p4077_p4, %p97_p3  ;;  %s4885_s16 = int_to_ptr.vmem [resolvable:$true] %s463_s16 }
  0x25   : > { %5949 = sst [smem:[#allocation35_spill]] %s4872_s20  ;;  %s4888_s15 = sshll.u32 %s4866_s18, 4 }
  0x26   : > { %s5951_s14 = scalar_select %p4881_p6, 1, 0 }
  0x27   : > { %p4895_p8 = pneg %p4881_p6 }
  0x28   : > { %s4878_s23 = scalar_lea.hbm %s5950_s1, %s4869_s19  ;;  %s4232_s13 = scalar_lea.hbm %s5950_s1, 32 }
  0x29   : > { %s4227_s27 = scalar_lea.hbm %s4878_s23, 16  ;;  %p4233_p11 = scmp.lt.u32.totalorder %s4878_s23, %s5950_s1 }
  0x2a   : > { %p4228_p7 = scmp.ne.s32.totalorder %s4878_s23, %s4227_s27  ;;  %p4234_p12 = scmp.lt.u32.totalorder %s4232_s13, %s4227_s27 }
  0x2b   : > { %s5952_s21 = scalar_select %p4895_p8, 1, 0 }
  0x2c   : > { %p4230_p9 = pnand %p4895_p8, %p4228_p7  ;;  %p4235_p13 = por %p4234_p12, %p4233_p11 }
  0x2d   : > { %p4236_p0 = scmp.lt.u32.totalorder %s4227_s27, %s4878_s23 }
  0x2e   : > { %p4231_p10 = pneg %p4230_p9 }
  0x2f   : > { %p4237_p1 = por %p4236_p0, %p4235_p13 }
  0x31   : > { %p4238_p2 = pnand %p4237_p1, %p4231_p10 }
  0x33   : > { %4241 = shalt.err (!%p4238_p2)
}
  0x34   : > { %s4242_s20 = scalar_lea.vmem %s4885_s16, 16  ;;  %s4721_s22 = smov [#allocation5]  }
  0x35   : > { %p4243_p3 = scmp.ne.s32.totalorder %s4885_s16, %s4242_s20  ;;  %s4247_s24 = sshll.u32 %s4721_s22, 4  ;;  %s4248_s24 = int_to_ptr.vmem [resolvable:$false] %s4247_s24 }
  0x36   : > { %s4249_s12 = scalar_lea.vmem %s4248_s24, 32  ;;  %p4250_p7 = scmp.lt.s32.totalorder %s4885_s16, %s4248_s24 }
  0x37   : > { %p4245_p4 = pnand %p4243_p3, %p4895_p8  ;;  %p4251_p9 = scmp.lt.s32.totalorder %s4249_s12, %s4242_s20 }
  0x39   : > { %p4246_p5 = pneg %p4245_p4  ;;  %p4252_p11 = por %p4251_p9, %p4250_p7 }
  0x3b   : > { %p4253_p12 = pnand %p4252_p11, %p4246_p5 }
  0x3d   : > { %4256 = shalt.err (!%p4253_p12)
}
  0x3e   : > { %s5953_s13 = scalar_lea.sflag [#allocation6], %s4863_s17  ;;  %s4921_s27 = sshll.u32 %s4715_s29, 8 }
  0x3f   : > { %4042 = dma.hbm_to_vmem [thread:$0]  (!%p4881_p6), %s4878_s23, 16, %s4885_s16, %s5953_s13  }
  0x40   : > { %s5954_s3 = sld [smem:[#allocation38_spill]]  ;;  %s491_s24 = scalar_lea.vmem [#allocation8], %s4888_s15 }
  0x41   : > { %s498_s12 = sshll.u32 %s491_s24, 4  ;;  %s5922_s1 = scalar_lea.sflag [#allocation9], %s4863_s17  ;;  %s4930_s12 = int_to_ptr.vmem [resolvable:$true] %s498_s12 }
  0x46   : > { %s4927_s20 = scalar_lea.hbm %s5954_s3, %s4921_s27  ;;  %s4262_s13 = scalar_lea.hbm %s5954_s3, 512 }
  0x47   : > { %s4257_s10 = scalar_lea.hbm %s4927_s20, 256  ;;  %p4263_p1 = scmp.lt.u32.totalorder %s4927_s20, %s5954_s3 }
  0x48   : > { %p4258_p10 = scmp.ne.s32.totalorder %s4927_s20, %s4257_s10  ;;  %p4264_p2 = scmp.lt.u32.totalorder %s4262_s13, %s4257_s10 }
  0x49   : > { %p4266_p4 = scmp.lt.u32.totalorder %s4257_s10, %s4927_s20 }
  0x4a   : > { %p4260_p13 = pnand %p4258_p10, %p4895_p8  ;;  %p4265_p3 = por %p4264_p2, %p4263_p1 }
  0x4c   : > { %p4261_p0 = pneg %p4260_p13  ;;  %p4267_p5 = por %p4266_p4, %p4265_p3 }
  0x4e   : > { %p4268_p7 = pnand %p4267_p5, %p4261_p0 }
  0x50   : > { %4271 = shalt.err (!%p4268_p7)
}
  0x51   : > { %s4272_s24 = scalar_lea.vmem %s4930_s12, 256  ;;  %s4722_s23 = smov [#allocation8]  }
  0x52   : > { %p4273_p9 = scmp.ne.s32.totalorder %s4930_s12, %s4272_s24  ;;  %s4277_s16 = sshll.u32 %s4722_s23, 4  ;;  %s4278_s16 = int_to_ptr.vmem [resolvable:$false] %s4277_s16 }
  0x53   : > { %s4279_s28 = scalar_lea.vmem %s4278_s16, 512  ;;  %p4280_p10 = scmp.lt.s32.totalorder %s4930_s12, %s4278_s16 }
  0x54   : > { %p4275_p11 = pnand %p4273_p9, %p4895_p8  ;;  %p4281_p13 = scmp.lt.s32.totalorder %s4279_s28, %s4272_s24 }
  0x56   : > { %p4276_p12 = pneg %p4275_p11  ;;  %p4282_p1 = por %p4281_p13, %p4280_p10 }
  0x58   : > { %p4283_p2 = pnand %p4282_p1, %p4276_p12 }
  0x5a   : > { %4286 = shalt.err (!%p4283_p2)
}
  0x5b   : > { %s5924_s10 = smov 64   ;;  %s4724_s13 = smov 4  }
  0x5c   : > { %4048 = dma.hbm_to_vmem [thread:$0]  (!%p4881_p6), %s4927_s20, 256, %s4930_s12, %s5922_s1, %s5924_s10, %s5924_s10, %s4724_s13  }
  0x5d   : > { %s5955_s5 = sld [smem:[#allocation39_spill]]  ;;  %s529_s16 = scalar_lea.vmem [#allocation11], %s4888_s15 }
  0x5e   : > { %s536_s28 = sshll.u32 %s529_s16, 4  ;;  %s5923_s3 = scalar_lea.sflag [#allocation12], %s4863_s17  ;;  %s4966_s28 = int_to_ptr.vmem [resolvable:$true] %s536_s28 }
  0x63   : > { %s4963_s23 = scalar_lea.hbm %s5955_s5, %s4921_s27  ;;  %s4292_s22 = scalar_lea.hbm %s5955_s5, 512 }
  0x64   : > { %s4287_s8 = scalar_lea.hbm %s4963_s23, 256  ;;  %p4293_p5 = scmp.lt.u32.totalorder %s4963_s23, %s5955_s5 }
  0x65   : > { %p4288_p0 = scmp.ne.s32.totalorder %s4963_s23, %s4287_s8  ;;  %p4294_p7 = scmp.lt.u32.totalorder %s4292_s22, %s4287_s8 }
  0x66   : > { %p4296_p11 = scmp.lt.u32.totalorder %s4287_s8, %s4963_s23 }
  0x67   : > { %p4290_p3 = pnand %p4288_p0, %p4895_p8  ;;  %p4295_p9 = por %p4294_p7, %p4293_p5 }
  0x69   : > { %p4291_p4 = pneg %p4290_p3  ;;  %p4297_p12 = por %p4296_p11, %p4295_p9 }
  0x6b   : > { %p4298_p10 = pnand %p4297_p12, %p4291_p4 }
  0x6d   : > { %4301 = shalt.err (!%p4298_p10)
}
  0x6e   : > { %s4302_s16 = scalar_lea.vmem %s4966_s28, 256  ;;  %s4725_s20 = smov [#allocation11]  }
  0x6f   : > { %p4303_p13 = scmp.ne.s32.totalorder %s4966_s28, %s4302_s16  ;;  %s4307_s12 = sshll.u32 %s4725_s20, 4  ;;  %s4308_s12 = int_to_ptr.vmem [resolvable:$false] %s4307_s12 }
  0x70   : > { %s4309_s1 = scalar_lea.vmem %s4308_s12, 512  ;;  %p4310_p0 = scmp.lt.s32.totalorder %s4966_s28, %s4308_s12 }
  0x71   : > { %p4305_p1 = pnand %p4303_p13, %p4895_p8  ;;  %p4311_p3 = scmp.lt.s32.totalorder %s4309_s1, %s4302_s16 }
  0x73   : > { %p4306_p2 = pneg %p4305_p1  ;;  %p4312_p5 = por %p4311_p3, %p4310_p0 }
  0x75   : > { %p4313_p7 = pnand %p4312_p5, %p4306_p2 }
  0x77   : > { %4316 = shalt.err (!%p4313_p7)
}
  0x78   : > { %4054 = dma.hbm_to_vmem [thread:$0]  (!%p4881_p6), %s4963_s23, 256, %s4966_s28, %s5923_s3, %s5924_s10, %s5924_s10, %s4724_s13  }
  0x79   : > { %s5956_s7 = sld [smem:[#allocation40_spill]]  ;;  %s566_s16 = scalar_lea.vmem [#allocation14], %s4866_s18 }
  0x7a   : > { %s573_s20 = sshll.u32 %s566_s16, 4  ;;  %s5936_s12 = scalar_lea.sflag [#allocation15], %s4863_s17  ;;  %s574_s20 = int_to_ptr.vmem [resolvable:$true] %s573_s20 }
  0x7f   : > { %s4999_s24 = scalar_lea.hbm %s5956_s7, %s4869_s19  ;;  %s4322_s28 = scalar_lea.hbm %s5956_s7, 32 }
  0x80   : > { %s4317_s1 = scalar_lea.hbm %s4999_s24, 16  ;;  %p4323_p12 = scmp.lt.u32.totalorder %s4999_s24, %s5956_s7 }
  0x81   : > { %p4318_p4 = scmp.ne.s32.totalorder %s4999_s24, %s4317_s1  ;;  %p4324_p10 = scmp.lt.u32.totalorder %s4322_s28, %s4317_s1 }
  0x82   : > { %p4326_p1 = scmp.lt.u32.totalorder %s4317_s1, %s4999_s24 }
  0x83   : > { %p4320_p9 = pnand %p4318_p4, %p4895_p8  ;;  %p4325_p13 = por %p4324_p10, %p4323_p12 }
  0x85   : > { %p4321_p11 = pneg %p4320_p9  ;;  %p4327_p2 = por %p4326_p1, %p4325_p13 }
  0x87   : > { %p4328_p0 = pnand %p4327_p2, %p4321_p11 }
  0x89   : > { %4331 = shalt.err (!%p4328_p0)
}
  0x8a   : > { %s4332_s16 = scalar_lea.vmem %s574_s20, 16  ;;  %s4726_s3 = smov [#allocation14]  }
  0x8b   : > { %p4333_p3 = scmp.ne.s32.totalorder %s574_s20, %s4332_s16  ;;  %s4337_s10 = sshll.u32 %s4726_s3, 4  ;;  %s4338_s10 = int_to_ptr.vmem [resolvable:$false] %s4337_s10 }
  0x8c   : > { %s4339_s5 = scalar_lea.vmem %s4338_s10, 32  ;;  %p4340_p4 = scmp.lt.s32.totalorder %s574_s20, %s4338_s10 }
  0x8d   : > { %p4335_p5 = pnand %p4333_p3, %p4895_p8  ;;  %p4341_p9 = scmp.lt.s32.totalorder %s4339_s5, %s4332_s16 }
  0x8f   : > { %p4336_p7 = pneg %p4335_p5  ;;  %p4342_p6 = por %p4341_p9, %p4340_p4 }
  0x91   : > { %p4343_p10 = pnand %p4342_p6, %p4336_p7 }
  0x93   : > { %4346 = shalt.err (!%p4343_p10)
}
  0x94   : > { %p5957_p12 = scmp.ne.s32.totalorder %s5951_s14, 0  ;;  %s5026_s23 = scalar_lea.hbm %s5911_s9, %s4921_s27 }
  0x95   : > { %s601_s10 = scalar_lea.vmem [#allocation17], %s4888_s15  ;;  %s3737_s8 = sshll.u32 %s4866_s18, 6 }
  0x96   : > { %4060 = dma.hbm_to_vmem [thread:$0]  (!%p5957_p12), %s4999_s24, 16, %s574_s20, %s5936_s12  }
  0x97   : > { %s608_s28 = sshll.u32 %s601_s10, 4  ;;  %s5929_s22 = scalar_lea.sflag [#allocation18], %s4863_s17  ;;  %s5029_s28 = int_to_ptr.vmem [resolvable:$true] %s608_s28 }
  0x98   : > { %s4347_s16 = scalar_lea.hbm %s5026_s23, 256  ;;  %s4352_s27 = scalar_lea.hbm %s5911_s9, 512 }
  0x99   : > { %p4348_p6 = scmp.ne.s32.totalorder %s5026_s23, %s4347_s16  ;;  %p4353_p1 = scmp.lt.u32.totalorder %s5026_s23, %s5911_s9 }
  0x9a   : > { %p4354_p2 = scmp.lt.u32.totalorder %s4352_s27, %s4347_s16  ;;  %p4356_p3 = scmp.lt.u32.totalorder %s4347_s16, %s5026_s23 }
  0x9b   : > { %p4350_p11 = pnand %p4348_p6, %p4895_p8 }
  0x9c   : > { %p4355_p0 = por %p4354_p2, %p4353_p1 }
  0x9d   : > { %p4351_p13 = pneg %p4350_p11 }
  0x9e   : > { %p4357_p5 = por %p4356_p3, %p4355_p0 }
  0xa0   : > { %p4358_p7 = pnand %p4357_p5, %p4351_p13 }
  0xa2   : > { %4361 = shalt.err (!%p4358_p7)
}
  0xa3   : > { %s4362_s15 = scalar_lea.vmem %s5029_s28, 256  ;;  %s4727_s3 = smov [#allocation17]  }
  0xa4   : > { %p4363_p4 = scmp.ne.s32.totalorder %s5029_s28, %s4362_s15  ;;  %s4367_s10 = sshll.u32 %s4727_s3, 4  ;;  %s4368_s10 = int_to_ptr.vmem [resolvable:$false] %s4367_s10 }
  0xa5   : > { %s4369_s24 = scalar_lea.vmem %s4368_s10, 512  ;;  %p4370_p6 = scmp.lt.s32.totalorder %s5029_s28, %s4368_s10 }
  0xa6   : > { %p4365_p9 = pnand %p4363_p4, %p4895_p8  ;;  %p4371_p11 = scmp.lt.s32.totalorder %s4369_s24, %s4362_s15 }
  0xa8   : > { %p4366_p10 = pneg %p4365_p9  ;;  %p4372_p1 = por %p4371_p11, %p4370_p6 }
  0xaa   : > { %p4373_p2 = pnand %p4372_p1, %p4366_p10 }
  0xac   : > { %4376 = shalt.err (!%p4373_p2)
}
  0xad   : > { %s5958_s16 = smov 64   ;;  %s3812_s20 = sshll.u32 %s4715_s29, 10 }
  0xae   : > { %4066 = dma.hbm_to_vmem [thread:$0]  (!%p5957_p12), %s5026_s23, 256, %s5029_s28, %s5929_s22, %s5958_s16, %s5958_s16, %s4724_s13  }
  0xaf   : > { %s5063_s1 = scalar_lea.hbm %s5913_s11, %s3812_s20  ;;  %s639_s15 = scalar_lea.vmem [#allocation20], %s3737_s8 }
  0xb0   : > { %s646_s3 = sshll.u32 %s639_s15, 4  ;;  %s5928_s10 = scalar_lea.sflag [#allocation21], %s4863_s17  ;;  %s5067_s3 = int_to_ptr.vmem [resolvable:$true] %s646_s3 }
  0xb1   : > { %s4377_s24 = scalar_lea.hbm %s5063_s1, 1024  ;;  %s4382_s20 = scalar_lea.hbm %s5913_s11, 2048 }
  0xb2   : > { %p4378_p13 = scmp.ne.s32.totalorder %s5063_s1, %s4377_s24  ;;  %p4383_p5 = scmp.lt.u32.totalorder %s5063_s1, %s5913_s11 }
  0xb3   : > { %p4384_p7 = scmp.lt.u32.totalorder %s4382_s20, %s4377_s24  ;;  %p4386_p9 = scmp.lt.u32.totalorder %s4377_s24, %s5063_s1 }
  0xb4   : > { %p4380_p0 = pnand %p4378_p13, %p4895_p8 }
  0xb5   : > { %p4385_p4 = por %p4384_p7, %p4383_p5 }
  0xb6   : > { %p4381_p3 = pneg %p4380_p0 }
  0xb7   : > { %p4387_p10 = por %p4386_p9, %p4385_p4 }
  0xb9   : > { %p4388_p6 = pnand %p4387_p10, %p4381_p3 }
  0xbb   : > { %4391 = shalt.err (!%p4388_p6)
}
  0xbc   : > { %s4392_s8 = scalar_lea.vmem %s5067_s3, 1024  ;;  %s4728_s15 = smov [#allocation20]  }
  0xbd   : > { %p4393_p11 = scmp.ne.s32.totalorder %s5067_s3, %s4392_s8  ;;  %s4397_s23 = sshll.u32 %s4728_s15, 4  ;;  %s4398_s23 = int_to_ptr.vmem [resolvable:$false] %s4397_s23 }
  0xbe   : > { %s4399_s28 = scalar_lea.vmem %s4398_s23, 2048  ;;  %p4400_p13 = scmp.lt.s32.totalorder %s5067_s3, %s4398_s23 }
  0xbf   : > { %p4395_p1 = pnand %p4393_p11, %p4895_p8  ;;  %p4401_p0 = scmp.lt.s32.totalorder %s4399_s28, %s4392_s8 }
  0xc1   : > { %p4396_p2 = pneg %p4395_p1  ;;  %p4402_p5 = por %p4401_p0, %p4400_p13 }
  0xc3   : > { %p4403_p7 = pnand %p4402_p5, %p4396_p2 }
  0xc5   : > { %4406 = shalt.err (!%p4403_p7)
}
  0xc6   : > { %4072 = dma.hbm_to_vmem [thread:$0]  (!%p5957_p12), %s5063_s1, 1024, %s5067_s3, %s5928_s10, %s5958_s16, %s5958_s16, %s4724_s13  }
  0xc7   : > { %s5097_s24 = sadd.s32 4294967295, %s4719_s30   ;;  %p101_p3 = scmp.ne.s32.totalorder %s4703_s26, %s4699_s25 }
  0xc8   : > { %p5930_p4 = scmp.eq.s32.totalorder %s5097_s24, 0  ;;  %p3718_p9 = scmp.ge.s32.totalorder %s4719_s30, 1 }
  0xc9   : > { %p424_p10 = scmp.lt.s32.totalorder %s4719_s30, 3  ;;  %s4729_s13 = smov [#allocation2]  }
  0xca   : > { %p5106_p6 = por %p5930_p4, %p101_p3  ;;  %s439_s16 = sshll.u32 %s4729_s13, 4  ;;  %s440_s16 = int_to_ptr.vmem [resolvable:$true] %s439_s16 }
  0xcb   : > { %p5110_p11 = pnand %p3718_p9, %p424_p10  ;;  %s5126_s5 = scalar_lea.hbm %s5904_s2, %s4869_s19 }
  0xcc   : > { %s5959_s20 = scalar_select %p5106_p6, 1, 0 }
  0xcd   : > { %s5960_s27 = scalar_select %p5110_p11, 1, 0 }
  0xce   : > { %p4035_p1 = pneg %p5110_p11  ;;  %s473_s8 = scalar_lea.vmem [#allocation7], %s4866_s18 }
  0xcf   : > { %s480_s15 = sshll.u32 %s473_s8, 4  ;;  %s5962_s0 = sld [smem:[#allocation36_spill]]  ;;  %s5129_s15 = int_to_ptr.vmem [resolvable:$true] %s480_s15 }
  0xd0   : > { %p5118_p2 = pnand %p4035_p1, %p5930_p4 }
  0xd2   : > { %p4409_p0 = pneg %p5118_p2 }
  0xd5   : > { %s4407_s13 = scalar_lea.hbm %s5962_s0, 256 }
  0xd6   : > { %p4408_p13 = scmp.ne.s32.totalorder %s5962_s0, %s4407_s13  ;;  %p4414_p3 = scmp.lt.u32.totalorder %s4407_s13, %s5962_s0 }
  0xd8   : > { %p4410_p5 = pnand %p4409_p0, %p4408_p13 }
  0xda   : > { %p4411_p7 = pneg %p4410_p5 }
  0xdc   : > { %p4416_p9 = pnand %p4414_p3, %p4411_p7 }
  0xde   : > { %4419 = shalt.err (!%p4416_p9)
}
  0xdf   : > { %s4420_s8 = scalar_lea.vmem %s440_s16, 256  ;;  %p4428_p6 = scmp.lt.s32.totalorder %s440_s16, %s440_s16 }
  0xe0   : > { %p4421_p10 = scmp.ne.s32.totalorder %s440_s16, %s4420_s8  ;;  %p4429_p11 = scmp.lt.s32.totalorder %s4420_s8, %s4420_s8 }
  0xe2   : > { %p4423_p1 = pnand %p4421_p10, %p4409_p0  ;;  %p4430_p12 = por %p4429_p11, %p4428_p6 }
  0xe4   : > { %p4424_p4 = pneg %p4423_p1 }
  0xe6   : > { %p4431_p8 = pnand %p4430_p12, %p4424_p4 }
  0xe8   : > { %4434 = shalt.err (!%p4431_p8)
}
  0xe9   : > { %s4730_s22 = smov 128   ;;  %s4731_s10 = smov 8  }
  0xea   : > { %4038 = dma.hbm_to_vmem [thread:$0]  (!%p5118_p2), %s5962_s0, 256, %s440_s16, [#allocation3], %s4730_s22, %s4730_s22, %s4731_s10  }
  0xeb   : > { %s4435_s13 = scalar_lea.hbm %s5126_s5, 16  ;;  %p5963_p0 = scmp.ne.s32.totalorder %s5952_s21, 0 }
  0xec   : > { %p4436_p13 = scmp.ne.s32.totalorder %s5126_s5, %s4435_s13  ;;  %s4440_s8 = scalar_lea.hbm %s5904_s2, 32 }
  0xed   : > { %p4441_p8 = scmp.lt.u32.totalorder %s5126_s5, %s5904_s2  ;;  %p4442_p12 = scmp.lt.u32.totalorder %s4440_s8, %s4435_s13 }
  0xee   : > { %p4438_p5 = pnand %p4436_p13, %p5963_p0  ;;  %p4444_p11 = scmp.lt.u32.totalorder %s4435_s13, %s5126_s5 }
  0xef   : > { %p4443_p4 = por %p4442_p12, %p4441_p8 }
  0xf0   : > { %p4439_p6 = pneg %p4438_p5 }
  0xf1   : > { %p4445_p7 = por %p4444_p11, %p4443_p4 }
  0xf3   : > { %p4446_p3 = pnand %p4445_p7, %p4439_p6 }
  0xf5   : > { %4449 = shalt.err (!%p4446_p3)
}
  0xf6   : > { %s4450_s16 = scalar_lea.vmem %s5129_s15, 16  ;;  %s4732_s25 = smov [#allocation7]  }
  0xf7   : > { %p4451_p2 = scmp.ne.s32.totalorder %s5129_s15, %s4450_s16  ;;  %s4455_s22 = sshll.u32 %s4732_s25, 4  ;;  %s4456_s22 = int_to_ptr.vmem [resolvable:$false] %s4455_s22 }
  0xf8   : > { %s4457_s7 = scalar_lea.vmem %s4456_s22, 32  ;;  %p4458_p1 = scmp.lt.s32.totalorder %s5129_s15, %s4456_s22 }
  0xf9   : > { %p4453_p9 = pnand %p4451_p2, %p5963_p0  ;;  %p4459_p13 = scmp.lt.s32.totalorder %s4457_s7, %s4450_s16 }
  0xfb   : > { %p4454_p10 = pneg %p4453_p9  ;;  %p4460_p5 = por %p4459_p13, %p4458_p1 }
  0xfd   : > { %p4461_p8 = pnand %p4460_p5, %p4454_p10 }
  0xff   : > { %4464 = shalt.err (!%p4461_p8)
}
 0x100   : > { %p5964_p6 = scmp.ne.s32.totalorder %s5951_s14, 0  ;;  %s5965_s12 = scalar_lea.sflag [#allocation6], %s4863_s17 }
 0x101   : > { %s5174_s28 = scalar_lea.hbm %s5906_s4, %s4869_s19  ;;  %s511_s13 = scalar_lea.vmem [#allocation10], %s4866_s18 }
 0x102   : > { %4045 = dma.hbm_to_vmem [thread:$0]  (!%p5964_p6), %s5126_s5, 16, %s5129_s15, %s5965_s12  }
 0x103   : > { %s518_s1 = sshll.u32 %s511_s13, 4  ;;  %s4465_s3 = scalar_lea.hbm %s5174_s28, 16  ;;  %s519_s1 = int_to_ptr.vmem [resolvable:$true] %s518_s1 }
 0x104   : > { %p4466_p12 = scmp.ne.s32.totalorder %s5174_s28, %s4465_s3  ;;  %s4470_s5 = scalar_lea.hbm %s5906_s4, 32 }
 0x105   : > { %p4471_p7 = scmp.lt.u32.totalorder %s5174_s28, %s5906_s4  ;;  %p4472_p3 = scmp.lt.u32.totalorder %s4470_s5, %s4465_s3 }
 0x106   : > { %p4468_p4 = pnand %p4466_p12, %p5963_p0  ;;  %p4474_p9 = scmp.lt.u32.totalorder %s4465_s3, %s5174_s28 }
 0x107   : > { %p4473_p2 = por %p4472_p3, %p4471_p7 }
 0x108   : > { %p4469_p11 = pneg %p4468_p4 }
 0x109   : > { %p4475_p10 = por %p4474_p9, %p4473_p2 }
 0x10b   : > { %p4476_p1 = pnand %p4475_p10, %p4469_p11 }
 0x10d   : > { %4479 = shalt.err (!%p4476_p1)
}
 0x10e   : > { %s4480_s22 = scalar_lea.vmem %s519_s1, 16  ;;  %s4733_s7 = smov [#allocation10]  }
 0x10f   : > { %p4481_p13 = scmp.ne.s32.totalorder %s519_s1, %s4480_s22  ;;  %s4485_s12 = sshll.u32 %s4733_s7, 4  ;;  %s4486_s12 = int_to_ptr.vmem [resolvable:$false] %s4485_s12 }
 0x110   : > { %s4487_s10 = scalar_lea.vmem %s4486_s12, 32  ;;  %p4488_p12 = scmp.lt.s32.totalorder %s519_s1, %s4486_s12 }
 0x111   : > { %p4483_p5 = pnand %p4481_p13, %p5963_p0  ;;  %p4489_p4 = scmp.lt.s32.totalorder %s4487_s10, %s4480_s22 }
 0x113   : > { %p4484_p8 = pneg %p4483_p5  ;;  %p4490_p6 = por %p4489_p4, %p4488_p12 }
 0x115   : > { %p4491_p3 = pnand %p4490_p6, %p4484_p8 }
 0x117   : > { %4494 = shalt.err (!%p4491_p3)
}
 0x118   : > { %p5966_p7 = scmp.ne.s32.totalorder %s5951_s14, 0  ;;  %s5967_s23 = scalar_lea.sflag [#allocation9], %s4863_s17 }
 0x119   : > { %s5200_s8 = scalar_lea.hbm %s5908_s6, %s4869_s19  ;;  %s549_s16 = scalar_lea.vmem [#allocation13], %s4866_s18 }
 0x11a   : > { %4051 = dma.hbm_to_vmem [thread:$0]  (!%p5966_p7), %s5174_s28, 16, %s519_s1, %s5967_s23  }
 0x11b   : > { %s556_s5 = sshll.u32 %s549_s16, 4  ;;  %s4495_s15 = scalar_lea.hbm %s5200_s8, 16  ;;  %s557_s5 = int_to_ptr.vmem [resolvable:$true] %s556_s5 }
 0x11c   : > { %p4496_p6 = scmp.ne.s32.totalorder %s5200_s8, %s4495_s15  ;;  %s4500_s28 = scalar_lea.hbm %s5908_s6, 32 }
 0x11d   : > { %p4501_p9 = scmp.lt.u32.totalorder %s5200_s8, %s5908_s6  ;;  %p4502_p10 = scmp.lt.u32.totalorder %s4500_s28, %s4495_s15 }
 0x11e   : > { %p4498_p11 = pnand %p4496_p6, %p5963_p0  ;;  %p4504_p13 = scmp.lt.u32.totalorder %s4495_s15, %s5200_s8 }
 0x11f   : > { %p4503_p1 = por %p4502_p10, %p4501_p9 }
 0x120   : > { %p4499_p2 = pneg %p4498_p11 }
 0x121   : > { %p4505_p5 = por %p4504_p13, %p4503_p1 }
 0x123   : > { %p4506_p8 = pnand %p4505_p5, %p4499_p2 }
 0x125   : > { %4509 = shalt.err (!%p4506_p8)
}
 0x126   : > { %s4510_s12 = scalar_lea.vmem %s557_s5, 16  ;;  %s4734_s10 = smov [#allocation13]  }
 0x127   : > { %p4511_p12 = scmp.ne.s32.totalorder %s557_s5, %s4510_s12  ;;  %s4515_s23 = sshll.u32 %s4734_s10, 4  ;;  %s4516_s23 = int_to_ptr.vmem [resolvable:$false] %s4515_s23 }
 0x128   : > { %s4517_s13 = scalar_lea.vmem %s4516_s23, 32  ;;  %p4518_p6 = scmp.lt.s32.totalorder %s557_s5, %s4516_s23 }
 0x129   : > { %p4513_p4 = pnand %p4511_p12, %p5963_p0  ;;  %p4519_p11 = scmp.lt.s32.totalorder %s4517_s13, %s4510_s12 }
 0x12b   : > { %p4514_p3 = pneg %p4513_p4  ;;  %p4520_p7 = por %p4519_p11, %p4518_p6 }
 0x12d   : > { %p4521_p9 = pnand %p4520_p7, %p4514_p3 }
 0x12f   : > { %4524 = shalt.err (!%p4521_p9)
}
 0x130   : > { %p5968_p10 = scmp.ne.s32.totalorder %s5951_s14, 0  ;;  %s5969_s3 = scalar_lea.sflag [#allocation12], %s4863_s17 }
 0x131   : > { %s5970_s25 = sld [smem:[#allocation41_spill]]  ;;  %s583_s1 = scalar_lea.vmem [#allocation16], %s4866_s18 }
 0x132   : > { %4057 = dma.hbm_to_vmem [thread:$0]  (!%p5968_p10), %s5200_s8, 16, %s557_s5, %s5969_s3  }
 0x133   : > { %s590_s7 = sshll.u32 %s583_s1, 4  ;;  %s591_s7 = int_to_ptr.vmem [resolvable:$true] %s590_s7 }
 0x137   : > { %s5971_s22 = smov %s5970_s25  ;;  %s5226_s28 = scalar_lea.hbm %s5970_s25, %s4869_s19 }
 0x138   : > { %s4525_s12 = scalar_lea.hbm %s5226_s28, 16  ;;  %s4530_s8 = scalar_lea.hbm %s5971_s22, 32 }
 0x139   : > { %p4526_p7 = scmp.ne.s32.totalorder %s5226_s28, %s4525_s12  ;;  %p4531_p13 = scmp.lt.u32.totalorder %s5226_s28, %s5971_s22 }
 0x13a   : > { %p4532_p5 = scmp.lt.u32.totalorder %s4530_s8, %s4525_s12  ;;  %p4534_p12 = scmp.lt.u32.totalorder %s4525_s12, %s5226_s28 }
 0x13b   : > { %p4528_p2 = pnand %p4526_p7, %p5963_p0 }
 0x13c   : > { %p4533_p8 = por %p4532_p5, %p4531_p13 }
 0x13d   : > { %p4529_p1 = pneg %p4528_p2 }
 0x13e   : > { %p4535_p4 = por %p4534_p12, %p4533_p8 }
 0x140   : > { %p4536_p3 = pnand %p4535_p4, %p4529_p1 }
 0x142   : > { %4539 = shalt.err (!%p4536_p3)
}
 0x143   : > { %s4540_s3 = scalar_lea.vmem %s591_s7, 16  ;;  %s4735_s16 = smov [#allocation16]  }
 0x144   : > { %p4541_p6 = scmp.ne.s32.totalorder %s591_s7, %s4540_s3  ;;  %s4545_s15 = sshll.u32 %s4735_s16, 4  ;;  %s4546_s15 = int_to_ptr.vmem [resolvable:$false] %s4545_s15 }
 0x145   : > { %s4547_s25 = scalar_lea.vmem %s4546_s15, 32  ;;  %p4548_p7 = scmp.lt.s32.totalorder %s591_s7, %s4546_s15 }
 0x146   : > { %p4543_p11 = pnand %p4541_p6, %p5963_p0  ;;  %p4549_p2 = scmp.lt.s32.totalorder %s4547_s25, %s4540_s3 }
 0x148   : > { %p4544_p9 = pneg %p4543_p11  ;;  %p4550_p10 = por %p4549_p2, %p4548_p7 }
 0x14a   : > { %p4551_p5 = pnand %p4550_p10, %p4544_p9 }
 0x14c   : > { %4554 = shalt.err (!%p4551_p5)
}
 0x14d   : > { %p5972_p13 = scmp.ne.s32.totalorder %s5951_s14, 0  ;;  %s5973_s1 = scalar_lea.sflag [#allocation15], %s4863_s17 }
 0x14e   : > { %s5974_s23 = sld [smem:[#allocation42_spill]]  ;;  %s621_s5 = scalar_lea.vmem [#allocation19], %s4866_s18 }
 0x14f   : > { %4063 = dma.hbm_to_vmem [thread:$0]  (!%p5972_p13), %s5226_s28, 16, %s591_s7, %s5973_s1  }
 0x150   : > { %s628_s13 = sshll.u32 %s621_s5, 4  ;;  %s629_s13 = int_to_ptr.vmem [resolvable:$true] %s628_s13 }
 0x154   : > { %s5252_s8 = scalar_lea.hbm %s5974_s23, %s4869_s19  ;;  %s4560_s28 = scalar_lea.hbm %s5974_s23, 32 }
 0x155   : > { %s4555_s3 = scalar_lea.hbm %s5252_s8, 16  ;;  %p4561_p12 = scmp.lt.u32.totalorder %s5252_s8, %s5974_s23 }
 0x156   : > { %p4556_p10 = scmp.ne.s32.totalorder %s5252_s8, %s4555_s3  ;;  %p4562_p4 = scmp.lt.u32.totalorder %s4560_s28, %s4555_s3 }
 0x157   : > { %p4564_p6 = scmp.lt.u32.totalorder %s4555_s3, %s5252_s8 }
 0x158   : > { %p4558_p1 = pnand %p4556_p10, %p5963_p0  ;;  %p4563_p3 = por %p4562_p4, %p4561_p12 }
 0x15a   : > { %p4559_p8 = pneg %p4558_p1  ;;  %p4565_p11 = por %p4564_p6, %p4563_p3 }
 0x15c   : > { %p4566_p9 = pnand %p4565_p11, %p4559_p8 }
 0x15e   : > { %4569 = shalt.err (!%p4566_p9)
}
 0x15f   : > { %s4570_s1 = scalar_lea.vmem %s629_s13, 16  ;;  %s4736_s12 = smov [#allocation19]  }
 0x160   : > { %p4571_p7 = scmp.ne.s32.totalorder %s629_s13, %s4570_s1  ;;  %s4575_s10 = sshll.u32 %s4736_s12, 4  ;;  %s4576_s10 = int_to_ptr.vmem [resolvable:$false] %s4575_s10 }
 0x161   : > { %s4577_s5 = scalar_lea.vmem %s4576_s10, 32  ;;  %p4578_p10 = scmp.lt.s32.totalorder %s629_s13, %s4576_s10 }
 0x162   : > { %p4573_p2 = pnand %p4571_p7, %p5963_p0  ;;  %p4579_p1 = scmp.lt.s32.totalorder %s4577_s5, %s4570_s1 }
 0x164   : > { %p4574_p5 = pneg %p4573_p2  ;;  %p4580_p13 = por %p4579_p1, %p4578_p10 }
 0x166   : > { %p4581_p4 = pnand %p4580_p13, %p4574_p5 }
 0x168   : > { %4584 = shalt.err (!%p4581_p4)
}
 0x169   : > { %p5975_p12 = scmp.ne.s32.totalorder %s5951_s14, 0  ;;  %s5976_s3 = scalar_lea.sflag [#allocation18], %s4863_s17 }
 0x16a   : > { %s5977_s28 = sld [smem:[#allocation43_spill]]  ;;  %s659_s1 = scalar_lea.vmem [#allocation22], %s4866_s18 }
 0x16b   : > { %4069 = dma.hbm_to_vmem [thread:$0]  (!%p5975_p12), %s5252_s8, 16, %s629_s13, %s5976_s3  }
 0x16c   : > { %s666_s12 = sshll.u32 %s659_s1, 4  ;;  %s667_s12 = int_to_ptr.vmem [resolvable:$true] %s666_s12 }
 0x170   : > { %s5978_s7 = smov %s5977_s28  ;;  %s5278_s25 = scalar_lea.hbm %s5977_s28, %s4869_s19 }
 0x171   : > { %s4585_s10 = scalar_lea.hbm %s5278_s25, 16  ;;  %s4590_s8 = scalar_lea.hbm %s5978_s7, 32 }
 0x172   : > { %p4586_p13 = scmp.ne.s32.totalorder %s5278_s25, %s4585_s10  ;;  %p4591_p6 = scmp.lt.u32.totalorder %s5278_s25, %s5978_s7 }
 0x173   : > { %p4592_p11 = scmp.lt.u32.totalorder %s4590_s8, %s4585_s10  ;;  %p4594_p7 = scmp.lt.u32.totalorder %s4585_s10, %s5278_s25 }
 0x174   : > { %p4588_p8 = pnand %p4586_p13, %p5963_p0 }
 0x175   : > { %p4593_p9 = por %p4592_p11, %p4591_p6 }
 0x176   : > { %p4589_p3 = pneg %p4588_p8 }
 0x177   : > { %p4595_p2 = por %p4594_p7, %p4593_p9 }
 0x179   : > { %p4596_p5 = pnand %p4595_p2, %p4589_p3 }
 0x17b   : > { %4599 = shalt.err (!%p4596_p5)
}
 0x17c   : > { %s4600_s18 = scalar_lea.vmem %s667_s12, 16  ;;  %s4737_s19 = smov [#allocation22]  }
 0x17d   : > { %p4601_p10 = scmp.ne.s32.totalorder %s667_s12, %s4600_s18  ;;  %s4605_s16 = sshll.u32 %s4737_s19, 4  ;;  %s4606_s16 = int_to_ptr.vmem [resolvable:$false] %s4605_s16 }
 0x17e   : > { %s4607_s0 = scalar_lea.vmem %s4606_s16, 32  ;;  %p4608_p13 = scmp.lt.s32.totalorder %s667_s12, %s4606_s16 }
 0x17f   : > { %p4603_p1 = pnand %p4601_p10, %p5963_p0  ;;  %p4609_p8 = scmp.lt.s32.totalorder %s4607_s0, %s4600_s18 }
 0x181   : > { %p4604_p4 = pneg %p4603_p1  ;;  %p4610_p12 = por %p4609_p8, %p4608_p13 }
 0x183   : > { %p4611_p6 = pnand %p4610_p12, %p4604_p4 }
 0x185   : > { %4614 = shalt.err (!%p4611_p6)
}
 0x186   : > { %p5979_p11 = scmp.ne.s32.totalorder %s5951_s14, 0  ;;  %s5980_s15 = scalar_lea.sflag [#allocation21], %s4863_s17 }
 0x187   : > { %p5981_p3 = scmp.ne.s32.totalorder %s5960_s27, 0 }
 0x188   : > { %4075 = dma.hbm_to_vmem [thread:$0]  (!%p5979_p11), %s5278_s25, 16, %s667_s12, %s5980_s15  }
 0x189   : > { %675 = sbr.rel (%p5981_p3) target bundleno = 3283 (0xcd3), region = 72  ;;  %p5982_p0 = scmp.eq.s32.totalorder (!%p5981_p3), %s5097_s24, 0 }
 0x190   : > { %4666 = dma.done.wait (%p5982_p0), [#allocation3], 256   ;;  %p5983_p9 = pmov %p5982_p0 }
 0x191   : > { %s5307_s21 = sand.u32 1, %s5097_s24   ;;  %s5310_s14 = sand.u32 1, %s4703_s26  }
 0x192   : > { %4668 = vsyncadd (%p5983_p9), [#allocation3], 4294967040  ;;  %s682_s17 = scalar_lea.sflag [#allocation6], %s5307_s21  ;;  %s684_s28 = scalar_lea.vmem [#allocation5], %s5310_s14 }
 0x193   : > { %p5984_p12 = scmp.ne.s32.totalorder %s5959_s20, 0 }
 0x195   : > { %4670 = dma.done.wait (%p5984_p12), %s682_s17, 32  }
 0x196   : > { %4672 = vsyncadd (%p5984_p12), %s682_s17, 4294967264  ;;  %s5319_s27 = sshll.u32 %s5310_s14, 4  ;;  %s692_s25 = scalar_lea.vmem [#allocation7], %s5310_s14 }
 0x197   : > { %s698_s1 = scalar_lea.sflag [#allocation9], %s5307_s21  ;;  %s701_s12 = scalar_lea.vmem [#allocation8], %s5319_s27 }
 0x198   : > { %4674 = dma.done.wait (%p5984_p12), %s698_s1, 272  }
 0x199   : > { %4676 = vsyncadd (%p5984_p12), %s698_s1, 4294967024  ;;  %s709_s10 = scalar_lea.vmem [#allocation10], %s5310_s14  ;;  %s715_s5 = scalar_lea.sflag [#allocation12], %s5307_s21 }
 0x19a   : > { %s718_s8 = scalar_lea.vmem [#allocation11], %s5319_s27 }
 0x19b   : > { %4678 = dma.done.wait (%p5984_p12), %s715_s5, 272  }
 0x19c   : > { %4680 = vsyncadd (%p5984_p12), %s715_s5, 4294967024  ;;  %s726_s13 = scalar_lea.vmem [#allocation13], %s5310_s14  ;;  %s732_s3 = scalar_lea.sflag [#allocation15], %s5307_s21 }
 0x19d   : > { %s734_s18 = scalar_lea.vmem [#allocation14], %s5310_s14 }
 0x19e   : > { %4682 = dma.done.wait (%p5984_p12), %s732_s3, 32  }
 0x19f   : > { %4684 = vsyncadd (%p5984_p12), %s732_s3, 4294967264  ;;  %s748_s16 = scalar_lea.sflag [#allocation18], %s5307_s21  ;;  %s751_s0 = scalar_lea.vmem [#allocation17], %s5319_s27 }
 0x1a0   : > { %4686 = dma.done.wait (%p5984_p12), %s748_s16, 272  }
 0x1a1   : > { %4688 = vsyncadd (%p5984_p12), %s748_s16, 4294967024  ;;  %s3746_s15 = sshll.u32 %s5310_s14, 6  ;;  %s759_s17 = scalar_lea.vmem [#allocation19], %s5310_s14 }
 0x1a2   : > { %s765_s1 = scalar_lea.sflag [#allocation21], %s5307_s21  ;;  %s5352_s5 = scalar_lea.vmem [#allocation20], %s3746_s15 }
 0x1a3   : > { %4690 = dma.done.wait (%p5984_p12), %s765_s1, 1040  }
 0x1a4   : > { %4692 = vsyncadd (%p5984_p12), %s765_s1, 4294966256  ;;  %s776_s3 = scalar_lea.vmem [#allocation22], %s5310_s14  ;;  %s5985_s19 = sld [smem:[#allocation33_spill]] }
 0x1aa   : > { %p3747_p7 = scmp.ne.s32.totalorder %s5985_s19, 0 }
 0x1ab   : > { %v868_v0 = vld [vmem:[#allocation2] sm:$0xff] (!%p3747_p7)  ;;  %vm870_vm0 = vcmask (!%p3747_p7), 261120   ;;  %v869_v1 = vld [vmem:[#allocation2 + $0x8] sm:$0xff] (!%p3747_p7) }
 0x1ac   : > { %867 = sbr.rel (%p3747_p7) target bundleno = 435 (0x1b3), region = 128  ;;  %871 = vst.msk [vmem:[#allocation23] sm:$0xff] (!%p3747_p7), %vm870_vm0, %v868_v0  ;;  %872 = vst.msk [vmem:[#allocation23 + $0x8] sm:$0xff] (!%p3747_p7), %vm870_vm0, %v869_v1 }
 0x1b3 PF: > { %v873_v2 = vld [vmem:[#allocation23] sm:$0xff]  ;;  %vm882_vm1 = vcmask 261120   ;;  %v874_v3 = vld [vmem:[#allocation23 + $0x8] sm:$0xff]  ;;  %v4738_v17 = vmov 0.0   ;;  %vm4739_vm2 = vmmov 0   ;;  %s4740_s20 = smov 112   ;;  %v875_v51 = vlaneseq }
 0x1b4   : > { %v883_v4 = vsel %vm882_vm1, %v873_v2, 0.0  ;;  %v886_v5 = vsel %vm882_vm1, %v874_v3, 0.0  ;;  %v4163_v16 = vld [vmem:[%s701_s12] sm:$0xff]   ;;  %3863 = vmatprep.subr.bf16.mxu0 %v4738_v17  ;;  %3883 = vmatprep.subr.bf16.mxu1 %v4738_v17  ;;  %v4164_v18 = vld [vmem:[%s701_s12 + $0x8] sm:$0xff]   ;;  %s4741_s21 = smov 120   ;;  %vm1918_vm3 = vcmask 64512  }
 0x1b5   : > { %884 = vadd.xlane.f32.xlu0 %v883_v4  ;;  %3864 = vmatpush3.bf16.msra.mxu0 %v4163_v16  ;;  %v3748_v27 = vld [vmem:[%s684_s28] ss:$0 sm:$0xff]  ;;  %s4742_s28 = smov 104   ;;  %v4744_v52 = vmov 1983009808   ;;  %v5431_v57 = vshrl.u32 %v875_v51, 7 }
 0x1b6   : > { %3867 = vmatprep.mubr.msk.bf16.mxu0 %vm4739_vm2, %v4738_v17  ;;  %3865 = vmatprep.subr.bf16.mxu0 %v4738_v17  ;;  %v3749_v31 = vld [vmem:[%s692_s25] ss:$0 sm:$0xff]  ;;  %s4743_s25 = smov 96   ;;  %v1019_v53 = vunpack.c.l.s4 %v4744_v52  ;;  %v4745_v55 = vmov 1934713408   ;;  %s4746_s12 = smov 64  }
 0x1b7   : > { %3885 = vmatprep.mubr.msk.bf16.mxu1 %vm4739_vm2, %v4738_v17  ;;  %v3750_v36 = vld [vmem:[%s709_s10] ss:$0 sm:$0xff]  ;;  %v1051_v56 = vunpack.c.l.s4 %v4745_v55  ;;  %vm2396_vm5 = vcmask 1043456   ;;  %s4747_s10 = smov 16   ;;  %s4748_s19 = smov 8   ;;  %vm3060_vm6 = vcmask 130048  }
 0x1b8   : > { %v1020_v58 = vunpack.c.0.s8 %v1019_v53  ;;  %s4749_s16 = smov 24   ;;  %vm3063_vm7 = vcmask 195584   ;;  %s5988_s27 = scalar_lea.vmem [#allocation16], %s5310_s14 }
 0x1b9   : > { %887 = vadd.xlane.f32.xlu0 %v886_v5  ;;  %3866 = vmatpush3.bf16.msra.mxu0 %v4164_v18  ;;  %v1052_v61 = vunpack.c.0.s8 %v1051_v56  ;;  %p4079_p2 = scmp.eq.s32.totalorder %s5097_s24, 1 }
 0x1ba   : > { %3871 = vmatprep.subr.bf16.mxu0 %v4738_v17  ;;  %v5434_v62 = vsub.s32 %v1020_v58, %v5431_v57 }
 0x1bb   : > { %v5437_v5 = vsub.s32 %v1052_v61, %v5431_v57 }
 0x242   : > { %v885_v6 = vpop.xlane.xlu0 %884 }
 0x243   : > { %v890_v7 = vmul.f32 0.03125, %v885_v6 }
 0x245   : > { %v892_v8 = vsub.f32 %v873_v2, %v890_v7 }
 0x246   : > { %v888_v9 = vpop.xlane.xlu0 %887 }
 0x247   : > { %v891_v10 = vmul.f32 0.03125, %v888_v9  ;;  %v894_v11 = vmul.f32 %v892_v8, %v892_v8 }
 0x249   : > { %v893_v12 = vsub.f32 %v874_v3, %v891_v10  ;;  %v896_v13 = vsel %vm882_vm1, %v894_v11, 0.0 }
 0x24a   : > { %897 = vadd.xlane.f32.xlu1 %v896_v13 }
 0x24b   : > { %v895_v14 = vmul.f32 %v893_v12, %v893_v12 }
 0x24d   : > { %v899_v15 = vsel %vm882_vm1, %v895_v14, 0.0 }
 0x24e   : > { %900 = vadd.xlane.f32.xlu1 %v899_v15 }
 0x2d7   : > { %v898_v19 = vpop.xlane.xlu1 %897 }
 0x2d8   : > { %v902_v20 = vmul.f32 0.03125, %v898_v19 }
 0x2da   : > { %v904_v21 = vadd.f32 1e-05, %v902_v20 }
 0x2db   : > { %v901_v22 = vpop.xlane.xlu1 %900 }
 0x2dc   : > { %4177 = vrsqrt.f32 %v904_v21  ;;  %v903_v23 = vmul.f32 0.03125, %v901_v22 }
 0x2de   : > { %v905_v24 = vadd.f32 1e-05, %v903_v23 }
 0x2e0   : > { %4179 = vrsqrt.f32 %v905_v24 }
 0x2e6   : > { %v4178_v25 = vpop.eup %4177 }
 0x2e7   : > { %v908_v26 = vmul.f32 %v4178_v25, %v892_v8 }
 0x2e9   : > { %v916_v30 = vmul.f32 %v3748_v27, %v908_v26 }
 0x2ea   : > { %v4180_v28 = vpop.eup %4179 }
 0x2eb   : > { %v909_v29 = vmul.f32 %v4180_v28, %v893_v12  ;;  %v924_v33 = vadd.f32 %v3749_v31, %v916_v30 }
 0x2ed   : > { %v917_v32 = vmul.f32 %v3748_v27, %v909_v29 }
 0x2ef   : > { %v925_v34 = vadd.f32 %v3749_v31, %v917_v32 }
 0x2f1   : > { %v926_v35 = vpack.c.bf16 %v925_v34, %v924_v33 }
 0x2f3   : > { %3868 = vmatmul.mubr.msk.bf16.vlgmr.msra.gmra.mrb[0].mxu0 %vm882_vm1, %v926_v35 }
 0x2f4   : > { %3873 = vmatprep.mubr.msk.bf16.mxu0 %vm4739_vm2, %v4738_v17 }
 0x3c6   : > { %v987_v37 = vpop.f32.mrb[0].mxu0 }
 0x3c7   : > { %v5385_v38 = vadd.f32 %v3750_v36, %v987_v37  ;;  %v3869_v39 = vpop.f32.mrb[1].mxu0 }
 0x3c8   : > { %v990_v40 = vpop.f32.mrb[2].mxu0 }
 0x3c9   : > { %1302 = vrot.lane.b32.xlu1 %v5385_v38, %s4740_s20  ;;  %1298 = vrot.lane.b32.xlu0 %v5385_v38, %s4741_s21  ;;  %v3870_v41 = vpop.f32.mrb[3].mxu0  ;;  %v5391_v42 = vadd.f32 %v3750_v36, %v990_v40  ;;  %v994_v45 = vmul.f32 0.35355338, %v5385_v38 }
 0x3cb   : > { %v5423_v50 = vmul.f32 0.35355338, %v5391_v42 }
 0x3cd   : > { %1306 = vrot.lane.b32.xlu1 %v5385_v38, %s4742_s28  ;;  %1304 = vrot.lane.b32.xlu0 %v5391_v42, %s4740_s20 }
 0x3d1   : > { %1310 = vrot.lane.b32.xlu0 %v5385_v38, %s4743_s25  ;;  %1300 = vrot.lane.b32.xlu1 %v5391_v42, %s4741_s21 }
 0x3d5   : > { %1308 = vrot.lane.b32.xlu1 %v5391_v42, %s4742_s28 }
 0x43b   : > { %v5400_v43 = vpop.permute.xlu1 %1302  ;;  %v5402_v44 = vpop.permute.xlu0 %1298 }
 0x43c   : > { %1318 = vrot.lane.b32.xlu0 %v5400_v43, %s4743_s25  ;;  %1314 = vrot.lane.b32.xlu1 %v5402_v44, %s4743_s25 }
 0x43f   : > { %v5407_v46 = vpop.permute.xlu1 %1306  ;;  %v5416_v48 = vpop.permute.xlu0 %1304 }
 0x440   : > { %998 = vrot.lane.b32.xlu0 %v994_v45, %s4741_s21  ;;  %1322 = vrot.lane.b32.xlu1 %v5407_v46, %s4743_s25 }
 0x443   : > { %v5412_v47 = vpop.permute.xlu1 %1300  ;;  %v1311_v54 = vpop.permute.xlu0 %1310 }
 0x444   : > { %1010 = vrot.lane.b32.xlu0 %v994_v45, %s4742_s28  ;;  %1004 = vrot.lane.b32.xlu1 %v994_v45, %s4740_s20 }
 0x447   : > { %v5418_v49 = vpop.permute.xlu1 %1308 }
 0x448   : > { %1312 = vrot.lane.b32.xlu1 %v5391_v42, %s4743_s25  ;;  %1316 = vrot.lane.b32.xlu0 %v5412_v47, %s4743_s25 }
 0x44c   : > { %1320 = vrot.lane.b32.xlu1 %v5416_v48, %s4743_s25  ;;  %1324 = vrot.lane.b32.xlu0 %v5418_v49, %s4743_s25 }
 0x450   : > { %1006 = vrot.lane.b32.xlu0 %v5423_v50, %s4740_s20  ;;  %1000 = vrot.lane.b32.xlu1 %v5423_v50, %s4741_s21 }
 0x454   : > { %1012 = vrot.lane.b32.xlu1 %v5423_v50, %s4742_s28 }
 0x4ae   : > { %v1319_v59 = vpop.permute.xlu0 %1318  ;;  %v1315_v60 = vpop.permute.xlu1 %1314 }
 0x4af   : > { %v1334_v63 = vcombine.low %v1311_v54, %v1319_v59  ;;  %v1335_v0 = vcombine.high %v1311_v54, %v1319_v59 }
 0x4b1   : > { %v1342_v6 = vrot.slane %v1334_v63, %v5434_v62  ;;  %v1349_v7 = vrot.slane %v1335_v0, %v5434_v62 }
 0x4b2   : > { %v999_v1 = vpop.permute.xlu0 %998  ;;  %v1323_v2 = vpop.permute.xlu1 %1322 }
 0x4b3   : > { %v1350_v3 = vcombine.low %v1315_v60, %v1323_v2  ;;  %v1351_v4 = vcombine.high %v1315_v60, %v1323_v2 }
 0x4b5   : > { %v1358_v8 = vrot.slane %v1350_v3, %v5434_v62  ;;  %v1365_v9 = vrot.slane %v1351_v4, %v5434_v62 }
 0x4b6   : > { %v1011_v10 = vpop.permute.xlu0 %1010  ;;  %v1005_v11 = vpop.permute.xlu1 %1004 }
 0x4b7   : > { %v1366_v12 = vcombine.low %v1342_v6, %v1358_v8  ;;  %v1367_v13 = vcombine.high %v1342_v6, %v1358_v8  ;;  %v1382_v14 = vcombine.low %v1349_v7, %v1365_v9  ;;  %v1383_v15 = vcombine.high %v1349_v7, %v1365_v9 }
 0x4b8   : > { %v1032_v16 = vcombine.low %v999_v1, %v1011_v10  ;;  %v1033_v18 = vcombine.high %v999_v1, %v1011_v10  ;;  %v1016_v19 = vcombine.low %v994_v45, %v1005_v11  ;;  %v1017_v20 = vcombine.high %v994_v45, %v1005_v11 }
 0x4b9   : > { %v1374_v21 = vrot.slane %v1366_v12, %v5437_v5  ;;  %v1381_v22 = vrot.slane %v1367_v13, %v5437_v5  ;;  %v1390_v23 = vrot.slane %v1382_v14, %v5437_v5  ;;  %v1397_v24 = vrot.slane %v1383_v15, %v5437_v5 }
 0x4ba   : > { %v1040_v25 = vrot.slane %v1032_v16, %v5434_v62  ;;  %v1047_v26 = vrot.slane %v1033_v18, %v5434_v62  ;;  %v1024_v27 = vrot.slane %v1016_v19, %v5434_v62  ;;  %v1031_v28 = vrot.slane %v1017_v20, %v5434_v62  ;;  %v1317_v29 = vpop.permute.xlu0 %1316  ;;  %v1313_v30 = vpop.permute.xlu1 %1312 }
 0x4bb   : > { %v1470_v31 = vcombine.low %v1374_v21, %v1381_v22  ;;  %v3758_v32 = vcombine.high %v1374_v21, %v1381_v22  ;;  %v1486_v33 = vcombine.low %v1390_v23, %v1397_v24  ;;  %v3759_v34 = vcombine.high %v1390_v23, %v1397_v24 }
 0x4bc   : > { %v1048_v35 = vcombine.low %v1024_v27, %v1040_v25  ;;  %v1049_v36 = vcombine.high %v1024_v27, %v1040_v25  ;;  %v1064_v37 = vcombine.low %v1031_v28, %v1047_v26  ;;  %v1065_v39 = vcombine.high %v1031_v28, %v1047_v26 }
 0x4bd   : > { %v5452_v40 = vrot.slane %v1470_v31, %v5434_v62  ;;  %v5455_v41 = vrot.slane %v3758_v32, %v5434_v62  ;;  %v5458_v45 = vrot.slane %v1486_v33, %v5434_v62  ;;  %v5461_v52 = vrot.slane %v3759_v34, %v5434_v62 }
 0x4be   : > { %v1056_v53 = vrot.slane %v1048_v35, %v5437_v5  ;;  %v1063_v54 = vrot.slane %v1049_v36, %v5437_v5  ;;  %v1072_v55 = vrot.slane %v1064_v37, %v5437_v5  ;;  %v1079_v56 = vrot.slane %v1065_v39, %v5437_v5  ;;  %v1325_v58 = vpop.permute.xlu0 %1324  ;;  %v1321_v59 = vpop.permute.xlu1 %1320 }
 0x4bf   : > { %v1418_v60 = vcombine.low %v1317_v29, %v1325_v58  ;;  %v1419_v61 = vcombine.high %v1317_v29, %v1325_v58  ;;  %v1402_v63 = vcombine.low %v1313_v30, %v1321_v59  ;;  %v1403_v0 = vcombine.high %v1313_v30, %v1321_v59 }
 0x4c0   : > { %v1152_v1 = vcombine.low %v1056_v53, %v1063_v54  ;;  %v3754_v2 = vcombine.high %v1056_v53, %v1063_v54  ;;  %v1168_v3 = vcombine.low %v1072_v55, %v1079_v56  ;;  %v3755_v4 = vcombine.high %v1072_v55, %v1079_v56 }
 0x4c1   : > { %v1426_v6 = vrot.slane %v1418_v60, %v5434_v62  ;;  %v1433_v7 = vrot.slane %v1419_v61, %v5434_v62  ;;  %v1410_v8 = vrot.slane %v1402_v63, %v5434_v62  ;;  %v1417_v9 = vrot.slane %v1403_v0, %v5434_v62 }
 0x4c2   : > { %v1159_v10 = vrot.slane %v1152_v1, %v5434_v62  ;;  %v1167_v11 = vrot.slane %v3754_v2, %v5434_v62  ;;  %v5474_v12 = vrot.slane %v1168_v3, %v5434_v62  ;;  %v5477_v13 = vrot.slane %v3755_v4, %v5434_v62  ;;  %v1007_v14 = vpop.permute.xlu0 %1006  ;;  %v1001_v15 = vpop.permute.xlu1 %1000 }
 0x4c3   : > { %v1434_v16 = vcombine.low %v1410_v8, %v1426_v6  ;;  %v1435_v18 = vcombine.high %v1410_v8, %v1426_v6  ;;  %v1450_v19 = vcombine.low %v1417_v9, %v1433_v7  ;;  %v1451_v20 = vcombine.high %v1417_v9, %v1433_v7 }
 0x4c4   : > { %v1184_v21 = vcombine.low %v1159_v10, %v1167_v11  ;;  %v1084_v22 = vcombine.low %v5423_v50, %v1007_v14  ;;  %v1085_v23 = vcombine.high %v5423_v50, %v1007_v14  ;;  %v1200_v28 = vcombine.low %v5474_v12, %v5477_v13 }
 0x4c5   : > { %v1442_v24 = vrot.slane %v1434_v16, %v5437_v5  ;;  %v1449_v25 = vrot.slane %v1435_v18, %v5437_v5  ;;  %v1458_v26 = vrot.slane %v1450_v19, %v5437_v5  ;;  %v1465_v27 = vrot.slane %v1451_v20, %v5437_v5 }
 0x4c6   : > { %v1092_v29 = vrot.slane %v1084_v22, %v5434_v62  ;;  %v1013_v30 = vpop.permute.xlu1 %1012  ;;  %v1502_v31 = vcombine.low %v5452_v40, %v5455_v41  ;;  %v1518_v50 = vcombine.low %v5458_v45, %v5461_v52  ;;  %v1099_v35 = vrot.slane %v1085_v23, %v5434_v62 }
 0x4c7   : > { %v1538_v32 = vcombine.low %v1442_v24, %v1449_v25  ;;  %v3760_v33 = vcombine.high %v1442_v24, %v1449_v25  ;;  %v1554_v34 = vcombine.low %v1458_v26, %v1465_v27  ;;  %v1100_v36 = vcombine.low %v1001_v15, %v1013_v30 }
 0x4c8   : > { %v1101_v37 = vcombine.high %v1001_v15, %v1013_v30  ;;  %v1510_v39 = vrot.slane %v1502_v31, %v5437_v5  ;;  %v1526_v53 = vrot.slane %v1518_v50, %v5437_v5  ;;  %v3761_v58 = vcombine.high %v1458_v26, %v1465_v27 }
 0x4c9   : > { %v5496_v54 = vrot.slane %v1538_v32, %v5434_v62  ;;  %v5499_v55 = vrot.slane %v3760_v33, %v5434_v62  ;;  %v5502_v56 = vrot.slane %v1554_v34, %v5434_v62  ;;  %v1108_v59 = vrot.slane %v1100_v36, %v5434_v62 }
 0x4ca   : > { %v1115_v60 = vrot.slane %v1101_v37, %v5434_v62  ;;  %v1534_v61 = vcombine.low %v1510_v39, %v1526_v53  ;;  %v1503_v63 = vcombine.high %v5452_v40, %v5455_v41  ;;  %v1519_v0 = vcombine.high %v5458_v45, %v5461_v52 }
 0x4cb   : > { %v1192_v1 = vrot.slane %v1184_v21, %v5437_v5  ;;  %v1208_v2 = vrot.slane %v1200_v28, %v5437_v5  ;;  %v1185_v3 = vcombine.high %v1159_v10, %v1167_v11  ;;  %v1116_v4 = vcombine.low %v1092_v29, %v1108_v59 }
 0x4cc   : > { %v1117_v6 = vcombine.high %v1092_v29, %v1108_v59  ;;  %v1132_v7 = vcombine.low %v1099_v35, %v1115_v60  ;;  %v1133_v8 = vcombine.high %v1099_v35, %v1115_v60  ;;  %v1569_v9 = vrot.slane %v3761_v58, %v5434_v62 }
 0x4cd   : > { %v1606_v14 = vpack.c.bf16 %v1534_v61, %v1534_v61  ;;  %v1517_v15 = vrot.slane %v1503_v63, %v5437_v5  ;;  %v1533_v16 = vrot.slane %v1519_v0, %v5437_v5  ;;  %v1124_v40 = vrot.slane %v1116_v4, %v5437_v5 }
 0x4ce   : > { %v1131_v41 = vrot.slane %v1117_v6, %v5437_v5  ;;  %v1140_v45 = vrot.slane %v1132_v7, %v5437_v5  ;;  %v1147_v52 = vrot.slane %v1133_v8, %v5437_v5  ;;  %v1216_v18 = vcombine.low %v1192_v1, %v1208_v2 }
 0x4cf   : > { %v1923_v10 = vsel %vm1918_vm3, %v1606_v14, 0  ;;  %v1536_v11 = vcombine.low %v1517_v15, %v1533_v16  ;;  %v1199_v19 = vrot.slane %v1185_v3, %v5437_v5  ;;  %v1201_v25 = vcombine.high %v5474_v12, %v5477_v13 }
 0x4d0   : > { %v1220_v20 = vcombine.low %v1124_v40, %v1131_v41  ;;  %v3756_v21 = vcombine.high %v1124_v40, %v1131_v41  ;;  %v1236_v22 = vcombine.low %v1140_v45, %v1147_v52  ;;  %v3757_v23 = vcombine.high %v1140_v45, %v1147_v52  ;;  %3872 = vmatpush3.bf16.xpose.msra.mxu0 %v1923_v10 }
 0x4d1   : > { %v1608_v24 = vpack.c.bf16 %v1536_v11, %v1536_v11  ;;  %3877 = vmatprep.subr.bf16.mxu0 %v4738_v17  ;;  %v1535_v26 = vcombine.high %v1510_v39, %v1526_v53  ;;  %v1570_v27 = vcombine.low %v5496_v54, %v5499_v55  ;;  %v1215_v32 = vrot.slane %v1201_v25, %v5437_v5 }
 0x4d2   : > { %v1227_v28 = vrot.slane %v1220_v20, %v5434_v62  ;;  %v1235_v29 = vrot.slane %v3756_v21, %v5434_v62  ;;  %v1243_v30 = vrot.slane %v1236_v22, %v5434_v62  ;;  %v1251_v31 = vrot.slane %v3757_v23, %v5434_v62 }
 0x4d3   : > { %v2015_v50 = vsel %vm1918_vm3, %v1608_v24, 0  ;;  %v1607_v33 = vpack.c.bf16 %v1535_v26, %v1535_v26  ;;  %v1288_v12 = vpack.c.bf16 %v1216_v18, %v1216_v18  ;;  %v1218_v13 = vcombine.low %v1199_v19, %v1215_v32 }
 0x4d4   : > { %v1252_v34 = vcombine.low %v1227_v28, %v1235_v29  ;;  %v1268_v35 = vcombine.low %v1243_v30, %v1251_v31  ;;  %3884 = vmatpush3.bf16.xpose.msra.mxu1 %v2015_v50  ;;  %v1578_v36 = vrot.slane %v1570_v27, %v5437_v5  ;;  %v1586_v37 = vcombine.low %v5502_v56, %v1569_v9 }
 0x4d5   : > { %3895 = vmatprep.subr.bf16.mxu1 %v4738_v17  ;;  %v1969_v39 = vsel %vm1918_vm3, %v1607_v33, 0  ;;  %v1537_v58 = vcombine.high %v1517_v15, %v1533_v16  ;;  %v1571_v59 = vcombine.high %v5496_v54, %v5499_v55  ;;  %v1587_v60 = vcombine.high %v5502_v56, %v1569_v9 }
 0x4d6   : > { %v1594_v53 = vrot.slane %v1586_v37, %v5437_v5  ;;  %v1217_v61 = vcombine.high %v1192_v1, %v1208_v2  ;;  %v1260_v63 = vrot.slane %v1252_v34, %v5437_v5  ;;  %v1276_v0 = vrot.slane %v1268_v35, %v5437_v5 }
 0x4d7   : > { %3874 = vmatmul.mubr.msk.bf16.vlgmr.msra.gmra.mrb[4].mxu0 %vm1918_vm3, %v1288_v12  ;;  %v1290_v3 = vpack.c.bf16 %v1218_v13, %v1218_v13  ;;  %v1585_v6 = vrot.slane %v1571_v59, %v5437_v5  ;;  %v1601_v7 = vrot.slane %v1587_v60, %v5437_v5  ;;  %v1609_v55 = vpack.c.bf16 %v1537_v58, %v1537_v58 }
 0x4d8   : > { %3878 = vmatpush3.bf16.xpose.msra.mxu0 %v1969_v39  ;;  %3879 = vmatprep.mubr.msk.bf16.mxu0 %vm4739_vm2, %v4738_v17  ;;  %v1602_v4 = vcombine.low %v1578_v36, %v1594_v53  ;;  %v1289_v1 = vpack.c.bf16 %v1217_v61, %v1217_v61  ;;  %v1284_v2 = vcombine.low %v1260_v63, %v1276_v0 }
 0x4d9   : > { %3889 = vmatprep.subr.bf16.mxu0 %v4738_v17  ;;  %v1604_v8 = vcombine.low %v1585_v6, %v1601_v7  ;;  %v1253_v9 = vcombine.high %v1227_v28, %v1235_v29  ;;  %v1269_v14 = vcombine.high %v1243_v30, %v1251_v31  ;;  %v2061_v15 = vsel %vm1918_vm3, %v1609_v55, 0 }
 0x4da   : > { %v1610_v54 = vpack.c.bf16 %v1602_v4, %v1602_v4  ;;  %v1603_v16 = vcombine.high %v1578_v36, %v1594_v53  ;;  %v1219_v40 = vcombine.high %v1199_v19, %v1215_v32  ;;  %v1292_v41 = vpack.c.bf16 %v1284_v2, %v1284_v2 }
 0x4db   : > { %3886 = vmatmul.mubr.msk.bf16.vlgmr.msra.gmra.mrb[0].mxu1 %vm1918_vm3, %v1290_v3  ;;  %v1612_v45 = vpack.c.bf16 %v1604_v8, %v1604_v8  ;;  %v1267_v10 = vrot.slane %v1253_v9, %v5437_v5  ;;  %v1283_v11 = vrot.slane %v1269_v14, %v5437_v5  ;;  %v1605_v22 = vcombine.high %v1585_v6, %v1601_v7 }
 0x4dc   : > { %3897 = vmatprep.mubr.msk.bf16.mxu1 %vm4739_vm2, %v4738_v17  ;;  %v2107_v56 = vsel %vm1918_vm3, %v1610_v54, 0  ;;  %v1611_v52 = vpack.c.bf16 %v1603_v16, %v1603_v16  ;;  %v1291_v20 = vpack.c.bf16 %v1219_v40, %v1219_v40  ;;  %v1285_v23 = vcombine.high %v1260_v63, %v1276_v0 }
 0x4dd   : > { %3896 = vmatpush3.bf16.xpose.msra.mxu1 %v2107_v56  ;;  %v2199_v18 = vsel %vm1918_vm3, %v1612_v45, 0  ;;  %v1286_v21 = vcombine.low %v1267_v10, %v1283_v11  ;;  %v1613_v25 = vpack.c.bf16 %v1605_v22, %v1605_v22  ;;  %v1287_v28 = vcombine.high %v1267_v10, %v1283_v11 }
 0x4de   : > { %3907 = vmatprep.subr.bf16.mxu1 %v4738_v17  ;;  %v2153_v19 = vsel %vm1918_vm3, %v1611_v52, 0  ;;  %v1293_v26 = vpack.c.bf16 %v1285_v23, %v1285_v23  ;;  %v878_v30 = vand.u32 127, %v875_v51 }
 0x4df   : > { %3880 = vmatmul.mubr.msk.bf16.vlgmr.msra.gmra.mrb[8].mxu0 %vm1918_vm3, %v1289_v1  ;;  %v1294_v24 = vpack.c.bf16 %v1286_v21, %v1286_v21  ;;  %v2245_v27 = vsel %vm1918_vm3, %v1613_v25, 0  ;;  %v1295_v29 = vpack.c.bf16 %v1287_v28, %v1287_v28 }
 0x4e0   : > { %3890 = vmatpush3.bf16.xpose.msra.mxu0 %v2061_v15  ;;  %3891 = vmatprep.mubr.msk.bf16.mxu0 %vm4739_vm2, %v4738_v17  ;;  %vm5583_vm4 = vcmp.le.s32.totalorder %v878_v30, %v5431_v57 }
 0x4e1   : > { %3901 = vmatprep.subr.bf16.mxu0 %v4738_v17 }
 0x4e4   : > { %3898 = vmatmul.mubr.msk.bf16.vlgmr.msra.gmra.mrb[4].mxu1 %vm1918_vm3, %v1292_v41 }
 0x4e5   : > { %3908 = vmatpush3.bf16.xpose.msra.mxu1 %v2199_v18  ;;  %3909 = vmatprep.mubr.msk.bf16.mxu1 %vm4739_vm2, %v4738_v17 }
 0x4e6   : > { %3919 = vmatprep.subr.bf16.mxu1 %v4738_v17 }
 0x4e7   : > { %3892 = vmatmul.mubr.msk.bf16.vlgmr.msra.gmra.mrb[12].mxu0 %vm1918_vm3, %v1291_v20 }
 0x4e8   : > { %3902 = vmatpush3.bf16.xpose.msra.mxu0 %v2153_v19  ;;  %3903 = vmatprep.mubr.msk.bf16.mxu0 %vm4739_vm2, %v4738_v17 }
 0x4e9   : > { %3913 = vmatprep.subr.bf16.mxu0 %v4738_v17 }
 0x4ec   : > { %3910 = vmatmul.mubr.msk.bf16.vlgmr.msra.gmra.mrb[8].mxu1 %vm1918_vm3, %v1294_v24 }
 0x4ed   : > { %3921 = vmatprep.mubr.msk.bf16.mxu1 %vm4739_vm2, %v4738_v17 }
 0x4ef   : > { %3904 = vmatmul.mubr.msk.bf16.vlgmr.msra.gmra.mrb[16].mxu0 %vm1918_vm3, %v1293_v26 }
 0x4f0   : > { %3914 = vmatpush3.bf16.xpose.msra.mxu0 %v2245_v27  ;;  %3915 = vmatprep.mubr.msk.bf16.mxu0 %vm4739_vm2, %v4738_v17 }
 0x4f1   : > { %3925 = vmatprep.subr.bf16.mxu0 %v4738_v17 }
 0x4f7   : > { %3916 = vmatmul.mubr.msk.bf16.vlgmr.msra.gmra.mrb[20].mxu0 %vm1918_vm3, %v1295_v29 }
 0x4f8   : > { %3927 = vmatprep.mubr.msk.bf16.mxu0 %vm4739_vm2, %v4738_v17 }
 0x5aa   : > { %v1959_v50 = vpop.f32.mrb[4].mxu0 }
 0x5ab   : > { %v2289_v32 = vsel %vm5583_vm4, %v1959_v50, -1e+30  ;;  %v3875_v33 = vpop.f32.mrb[5].mxu0 }
 0x5ac   : > { %v1962_v34 = vpop.f32.mrb[6].mxu0  ;;  %v2297_v35 = vsel %vm1918_vm3, %v2289_v32, -inf }
 0x5ad   : > { %2298 = vmax.xlane.f32.xlu0 %v2297_v35  ;;  %v3876_v12 = vpop.f32.mrb[7].mxu0 }
 0x5ae   : > { %v2051_v13 = vpop.f32.mrb[0].mxu1 }
 0x5af   : > { %v2291_v36 = vsel %vm5583_vm4, %v2051_v13, -1e+30  ;;  %v3887_v51 = vpop.f32.mrb[1].mxu1 }
 0x5b0   : > { %v2054_v37 = vpop.f32.mrb[2].mxu1  ;;  %v2303_v57 = vsel %vm1918_vm3, %v2291_v36, -inf }
 0x5b1   : > { %v3888_v39 = vpop.f32.mrb[3].mxu1  ;;  %2304 = vmax.xlane.f32.xlu0 %v2303_v57 }
 0x5b2   : > { %v2005_v53 = vpop.f32.mrb[8].mxu0 }
 0x5b3   : > { %v2290_v58 = vsel %vm5583_vm4, %v2005_v53, -1e+30  ;;  %v3881_v59 = vpop.f32.mrb[9].mxu0 }
 0x5b4   : > { %v2008_v60 = vpop.f32.mrb[10].mxu0  ;;  %v2300_v61 = vsel %vm1918_vm3, %v2290_v58, -inf }
 0x5b5   : > { %2301 = vmax.xlane.f32.xlu1 %v2300_v61  ;;  %v3882_v63 = vpop.f32.mrb[11].mxu0 }
 0x5b7   : > { %v2143_v0 = vpop.f32.mrb[4].mxu1 }
 0x5b8   : > { %v2293_v3 = vsel %vm5583_vm4, %v2143_v0, -1e+30  ;;  %v3899_v4 = vpop.f32.mrb[5].mxu1 }
 0x5b9   : > { %v2146_v6 = vpop.f32.mrb[6].mxu1  ;;  %v2309_v7 = vsel %vm1918_vm3, %v2293_v3, -inf }
 0x5ba   : > { %v2097_v54 = vpop.f32.mrb[12].mxu0  ;;  %v3900_v55 = vpop.f32.mrb[7].mxu1  ;;  %2310 = vmax.xlane.f32.xlu0 %v2309_v7 }
 0x5bb   : > { %v2292_v56 = vsel %vm5583_vm4, %v2097_v54, -1e+30  ;;  %v3893_v1 = vpop.f32.mrb[13].mxu0 }
 0x5bc   : > { %v2100_v2 = vpop.f32.mrb[14].mxu0  ;;  %v2306_v8 = vsel %vm1918_vm3, %v2292_v56, -inf }
 0x5bd   : > { %v3894_v9 = vpop.f32.mrb[15].mxu0 }
 0x5be   : > { %2307 = vmax.xlane.f32.xlu0 %v2306_v8 }
 0x5bf   : > { %v2235_v14 = vpop.f32.mrb[8].mxu1 }
 0x5c0   : > { %v5604_v15 = vsel %vm5583_vm4, %v2235_v14, -1e+30  ;;  %v3911_v16 = vpop.f32.mrb[9].mxu1 }
 0x5c1   : > { %v2238_v40 = vpop.f32.mrb[10].mxu1  ;;  %v2315_v41 = vsel %vm1918_vm3, %v5604_v15, -inf }
 0x5c2   : > { %v2189_v45 = vpop.f32.mrb[16].mxu0  ;;  %v3912_v52 = vpop.f32.mrb[11].mxu1  ;;  %2316 = vmax.xlane.f32.xlu0 %v2315_v41 }
 0x5c3   : > { %v2294_v10 = vsel %vm5583_vm4, %v2189_v45, -1e+30  ;;  %v3905_v11 = vpop.f32.mrb[17].mxu0 }
 0x5c4   : > { %v2192_v18 = vpop.f32.mrb[18].mxu0  ;;  %v2312_v25 = vsel %vm1918_vm3, %v2294_v10, -inf }
 0x5c5   : > { %v3906_v20 = vpop.f32.mrb[19].mxu0 }
 0x5c6   : > { %1618 = vrot.lane.b32.xlu1 %v5402_v44, %s4746_s12 }
 0x5ca   : > { %1622 = vrot.lane.b32.xlu1 %v5400_v43, %s4746_s12  ;;  %v2281_v19 = vpop.f32.mrb[20].mxu0 }
 0x5cb   : > { %v5616_v21 = vsel %vm5583_vm4, %v2281_v19, -1e+30  ;;  %v3917_v22 = vpop.f32.mrb[21].mxu0 }
 0x5cc   : > { %v2284_v23 = vpop.f32.mrb[22].mxu0  ;;  %v2318_v44 = vsel %vm1918_vm3, %v5616_v21, -inf }
 0x5cd   : > { %v3918_v24 = vpop.f32.mrb[23].mxu0 }
 0x5d8   : > { %1614 = vrot.lane.b32.xlu0 %v5385_v38, %s4746_s12 }
 0x5ee   : > { %2313 = vmax.xlane.f32.xlu1 %v2312_v25 }
 0x5f2   : > { %2319 = vmax.xlane.f32.xlu1 %v2318_v44 }
 0x603   : > { %1626 = vrot.lane.b32.xlu1 %v5407_v46, %s4746_s12 }
 0x63a   : > { %v2299_v43 = vpop.xlane.xlu0 %2298 }
 0x63b   : > { %v2321_v26 = vsub.f32 %v2289_v32, %v2299_v43 }
 0x63d   : > { %v2329_v27 = vmul.f32 1.442695, %v2321_v26 }
 0x63e   : > { %v2305_v28 = vpop.xlane.xlu0 %2304 }
 0x63f   : > { %4181 = vpow2.f32 %v2329_v27  ;;  %v2323_v29 = vsub.f32 %v2291_v36, %v2305_v28 }
 0x641   : > { %v2333_v30 = vmul.f32 1.442695, %v2323_v29 }
 0x642   : > { %v2302_v31 = vpop.xlane.xlu1 %2301 }
 0x643   : > { %4183 = vpow2.f32 %v2333_v30  ;;  %v2322_v38 = vsub.f32 %v2290_v58, %v2302_v31 }
 0x645   : > { %v2331_v50 = vmul.f32 1.442695, %v2322_v38 }
 0x646   : > { %v1619_v61 = vpop.permute.xlu1 %1618 }
 0x647   : > { %4185 = vpow2.f32 %v2331_v50  ;;  %v2311_v33 = vpop.xlane.xlu0 %2310 }
 0x648   : > { %v2325_v35 = vsub.f32 %v2293_v3, %v2311_v33 }
 0x649   : > { %v5625_v34 = vpop.eup %4181 }
 0x64a   : > { %v2345_v12 = vsel %vm1918_vm3, %v5625_v34, 0.0  ;;  %v2337_v46 = vmul.f32 1.442695, %v2325_v35  ;;  %v1623_v63 = vpop.permute.xlu1 %1622 }
 0x64b   : > { %2346 = vadd.xlane.f32.xlu0 %v2345_v12  ;;  %v2308_v32 = vpop.xlane.xlu0 %2307 }
 0x64c   : > { %4187 = vpow2.f32 %v2337_v46  ;;  %v2324_v36 = vsub.f32 %v2292_v56, %v2308_v32 }
 0x64d   : > { %v5629_v13 = vpop.eup %4183 }
 0x64e   : > { %v2351_v51 = vsel %vm1918_vm3, %v5629_v13, 0.0  ;;  %v2335_v37 = vmul.f32 1.442695, %v2324_v36 }
 0x64f   : > { %2352 = vadd.xlane.f32.xlu0 %v2351_v51  ;;  %v5651_v0 = vpop.xlane.xlu0 %2316 }
 0x650   : > { %4189 = vpow2.f32 %v2335_v37 }
 0x651   : > { %v5633_v57 = vpop.eup %4185 }
 0x652   : > { %v2348_v39 = vsel %vm1918_vm3, %v5633_v57, 0.0 }
 0x653   : > { %2349 = vadd.xlane.f32.xlu1 %v2348_v39  ;;  %v1615_v7 = vpop.permute.xlu0 %1614 }
 0x654   : > { %v1638_v55 = vcombine.low %v1615_v7, %v1623_v63  ;;  %v1639_v56 = vcombine.high %v1615_v7, %v1623_v63  ;;  %v2327_v63 = vsub.f32 %v5604_v15, %v5651_v0 }
 0x656   : > { %v5637_v53 = vpop.eup %4187 }
 0x657   : > { %v2357_v58 = vsel %vm1918_vm3, %v5637_v53, 0.0 }
 0x658   : > { %2358 = vadd.xlane.f32.xlu0 %v2357_v58 }
 0x65a   : > { %v5641_v59 = vpop.eup %4189 }
 0x65b   : > { %v2354_v60 = vsel %vm1918_vm3, %v5641_v59, 0.0 }
 0x65c   : > { %2355 = vadd.xlane.f32.xlu1 %v2354_v60 }
 0x66d   : > { %1620 = vrot.lane.b32.xlu1 %v5412_v47, %s4746_s12 }
 0x671   : > { %1624 = vrot.lane.b32.xlu1 %v5416_v48, %s4746_s12  ;;  %v1646_v48 = vrot.slane %v1638_v55, %v5434_v62 }
 0x675   : > { %1628 = vrot.lane.b32.xlu1 %v5418_v49, %s4746_s12  ;;  %v1653_v49 = vrot.slane %v1639_v56, %v5434_v62 }
 0x67b   : > { %v2314_v3 = vpop.xlane.xlu1 %2313 }
 0x67c   : > { %v2326_v4 = vsub.f32 %v2294_v10, %v2314_v3  ;;  %v2341_v3 = vmul.f32 1.442695, %v2327_v63 }
 0x67e   : > { %v2339_v6 = vmul.f32 1.442695, %v2326_v4 }
 0x67f   : > { %v2320_v54 = vpop.xlane.xlu1 %2319 }
 0x680   : > { %4191 = vpow2.f32 %v2339_v6  ;;  %v2328_v47 = vsub.f32 %v5616_v21, %v2320_v54 }
 0x682   : > { %v2343_v16 = vmul.f32 1.442695, %v2328_v47 }
 0x683   : > { %v1627_v1 = vpop.permute.xlu1 %1626 }
 0x684   : > { %v1654_v2 = vcombine.low %v1619_v61, %v1627_v1  ;;  %v1655_v8 = vcombine.high %v1619_v61, %v1627_v1  ;;  %4193 = vpow2.f32 %v2343_v16 }
 0x685   : > { %4195 = vpow2.f32 %v2341_v3 }
 0x686   : > { %v1662_v9 = vrot.slane %v1654_v2, %v5434_v62  ;;  %v1669_v14 = vrot.slane %v1655_v8, %v5434_v62 }
 0x688   : > { %v1670_v40 = vcombine.low %v1646_v48, %v1662_v9  ;;  %v1671_v41 = vcombine.high %v1646_v48, %v1662_v9  ;;  %v1686_v45 = vcombine.low %v1653_v49, %v1669_v14  ;;  %v1687_v52 = vcombine.high %v1653_v49, %v1669_v14 }
 0x68a   : > { %v5658_v10 = vpop.eup %4191  ;;  %v1678_v11 = vrot.slane %v1670_v40, %v5437_v5  ;;  %v1685_v18 = vrot.slane %v1671_v41, %v5437_v5  ;;  %v1694_v20 = vrot.slane %v1686_v45, %v5437_v5  ;;  %v1701_v19 = vrot.slane %v1687_v52, %v5437_v5 }
 0x68b   : > { %v2360_v21 = vsel %vm1918_vm3, %v5658_v10, 0.0 }
 0x68c   : > { %v1774_v22 = vcombine.low %v1678_v11, %v1685_v18  ;;  %v3762_v23 = vcombine.high %v1678_v11, %v1685_v18  ;;  %v1790_v24 = vcombine.low %v1694_v20, %v1701_v19  ;;  %v3763_v25 = vcombine.high %v1694_v20, %v1701_v19  ;;  %2361 = vadd.xlane.f32.xlu0 %v2360_v21 }
 0x68e   : > { %v1781_v44 = vrot.slane %v1774_v22, %v5434_v62  ;;  %v1789_v43 = vrot.slane %v3762_v23, %v5434_v62  ;;  %v1797_v26 = vrot.slane %v1790_v24, %v5434_v62  ;;  %v1805_v27 = vrot.slane %v3763_v25, %v5434_v62  ;;  %v5674_v51 = vpop.eup %4193 }
 0x68f   : > { %v2366_v61 = vsel %vm1918_vm3, %v5674_v51, 0.0  ;;  %v5686_v4 = vpop.eup %4195 }
 0x690   : > { %v1806_v28 = vcombine.low %v1781_v44, %v1789_v43  ;;  %v1822_v29 = vcombine.low %v1797_v26, %v1805_v27  ;;  %v1807_v30 = vcombine.high %v1781_v44, %v1789_v43  ;;  %v1823_v31 = vcombine.high %v1797_v26, %v1805_v27 }
 0x691   : > { %v2363_v6 = vsel %vm1918_vm3, %v5686_v4, 0.0 }
 0x692   : > { %v1814_v38 = vrot.slane %v1806_v28, %v5437_v5  ;;  %v1830_v50 = vrot.slane %v1822_v29, %v5437_v5  ;;  %v1821_v33 = vrot.slane %v1807_v30, %v5437_v5  ;;  %v1837_v35 = vrot.slane %v1823_v31, %v5437_v5 }
 0x694   : > { %v1838_v12 = vcombine.low %v1814_v38, %v1830_v50  ;;  %v1839_v46 = vcombine.high %v1814_v38, %v1830_v50  ;;  %v1840_v32 = vcombine.low %v1821_v33, %v1837_v35  ;;  %v1841_v36 = vcombine.high %v1821_v33, %v1837_v35 }
 0x696   : > { %v1910_v37 = vpack.c.bf16 %v1838_v12, %v1838_v12  ;;  %v1911_v39 = vpack.c.bf16 %v1839_v46, %v1839_v46  ;;  %v1912_v47 = vpack.c.bf16 %v1840_v32, %v1840_v32  ;;  %v1913_v49 = vpack.c.bf16 %v1841_v36, %v1841_v36 }
 0x698   : > { %v2398_v58 = vsel %vm2396_vm5, %v1910_v37, 0  ;;  %v2444_v60 = vsel %vm2396_vm5, %v1911_v39, 0  ;;  %v2490_v0 = vsel %vm2396_vm5, %v1912_v47, 0  ;;  %v2536_v16 = vsel %vm2396_vm5, %v1913_v49, 0 }
 0x699   : > { %3920 = vmatpush3.bf16.msra.mxu1 %v2398_v58  ;;  %3926 = vmatpush3.bf16.msra.mxu0 %v2444_v60 }
 0x69a   : > { %2367 = vadd.xlane.f32.xlu1 %v2366_v61  ;;  %3931 = vmatprep.subr.bf16.mxu1 %v4738_v17 }
 0x69b   : > { %3937 = vmatprep.subr.bf16.mxu0 %v4738_v17 }
 0x6a2   : > { %1616 = vrot.lane.b32.xlu0 %v5391_v42, %s4746_s12 }
 0x6c1   : > { %2364 = vadd.xlane.f32.xlu0 %v2363_v6 }
 0x6d8   : > { %v2347_v7 = vpop.xlane.xlu0 %2346 }
 0x6d9   : > { %4197 = vrcp.f32 %v2347_v7 }
 0x6dc   : > { %v2353_v54 = vpop.xlane.xlu0 %2352 }
 0x6dd   : > { %4199 = vrcp.f32 %v2353_v54 }
 0x6e0   : > { %v2350_v55 = vpop.xlane.xlu1 %2349 }
 0x6e1   : > { %4201 = vrcp.f32 %v2350_v55 }
 0x6e3   : > { %v4198_v56 = vpop.eup %4197 }
 0x6e4   : > { %v2377_v42 = vmul.f32 %v4198_v56, %v5625_v34 }
 0x6e5   : > { %v2359_v52 = vpop.xlane.xlu0 %2358 }
 0x6e6   : > { %v2385_v1 = vpack.c.bf16 %v2377_v42, %v2377_v42 }
 0x6e7   : > { %v4200_v15 = vpop.eup %4199 }
 0x6e8   : > { %3922 = vmatmul.mubr.msk.bf16.vlgmr.msra.gmra.mrb[12].mxu1 %vm1918_vm3, %v2385_v1  ;;  %v2379_v2 = vmul.f32 %v4200_v15, %v5629_v13 }
 0x6e9   : > { %3932 = vmatpush3.bf16.msra.mxu1 %v2490_v0  ;;  %3933 = vmatprep.mubr.msk.bf16.mxu1 %vm4739_vm2, %v4738_v17  ;;  %v2356_v8 = vpop.xlane.xlu1 %2355 }
 0x6ea   : > { %3943 = vmatprep.subr.bf16.mxu1 %v4738_v17  ;;  %4203 = vrcp.f32 %v2356_v8  ;;  %v2387_v14 = vpack.c.bf16 %v2379_v2, %v2379_v2 }
 0x6eb   : > { %v4202_v48 = vpop.eup %4201  ;;  %4205 = vrcp.f32 %v2359_v52 }
 0x6ec   : > { %v2378_v34 = vmul.f32 %v4202_v48, %v5633_v57 }
 0x6ed   : > { %v1621_v41 = vpop.permute.xlu1 %1620 }
 0x6ee   : > { %v2386_v9 = vpack.c.bf16 %v2378_v34, %v2378_v34 }
 0x6f0   : > { %3928 = vmatmul.mubr.msk.bf16.vlgmr.msra.gmra.mrb[24].mxu0 %vm1918_vm3, %v2386_v9  ;;  %3934 = vmatmul.mubr.msk.bf16.vlgmr.msra.gmra.mrb[16].mxu1 %vm1918_vm3, %v2387_v14 }
 0x6f1   : > { %3938 = vmatpush3.bf16.msra.mxu0 %v2536_v16  ;;  %3939 = vmatprep.mubr.msk.bf16.mxu0 %vm4739_vm2, %v4738_v17  ;;  %v1625_v45 = vpop.permute.xlu1 %1624 }
 0x6f2   : > { %3949 = vmatprep.subr.bf16.mxu0 %v4738_v17  ;;  %3945 = vmatprep.mubr.msk.bf16.mxu1 %vm4739_vm2, %v4738_v17 }
 0x6f4   : > { %v4204_v13 = vpop.eup %4203 }
 0x6f5   : > { %v2380_v57 = vmul.f32 %v4204_v13, %v5641_v59  ;;  %v1629_v11 = vpop.permute.xlu1 %1628  ;;  %v4206_v3 = vpop.eup %4205 }
 0x6f6   : > { %v1722_v20 = vcombine.low %v1621_v41, %v1629_v11  ;;  %v1723_v19 = vcombine.high %v1621_v41, %v1629_v11  ;;  %v2381_v0 = vmul.f32 %v4206_v3, %v5637_v53 }
 0x6f7   : > { %v2388_v40 = vpack.c.bf16 %v2380_v57, %v2380_v57 }
 0x6f8   : > { %v1730_v24 = vrot.slane %v1722_v20, %v5434_v62  ;;  %v1737_v59 = vrot.slane %v1723_v19, %v5434_v62  ;;  %v2389_v16 = vpack.c.bf16 %v2381_v0, %v2381_v0 }
 0x6f9   : > { %3940 = vmatmul.mubr.msk.bf16.vlgmr.msra.gmra.mrb[28].mxu0 %vm1918_vm3, %v2388_v40 }
 0x6fa   : > { %3951 = vmatprep.mubr.msk.bf16.mxu0 %vm4739_vm2, %v4738_v17 }
 0x719   : > { %v2362_v18 = vpop.xlane.xlu0 %2361 }
 0x71a   : > { %4207 = vrcp.f32 %v2362_v18 }
 0x71d   : > { %v1617_v21 = vpop.permute.xlu0 %1616 }
 0x71e   : > { %v1706_v22 = vcombine.low %v1617_v21, %v1625_v45  ;;  %v1707_v23 = vcombine.high %v1617_v21, %v1625_v45 }
 0x720   : > { %v1714_v25 = vrot.slane %v1706_v22, %v5434_v62  ;;  %v1721_v44 = vrot.slane %v1707_v23, %v5434_v62 }
 0x722   : > { %v1738_v43 = vcombine.low %v1714_v25, %v1730_v24  ;;  %v1739_v26 = vcombine.high %v1714_v25, %v1730_v24  ;;  %v1754_v27 = vcombine.low %v1721_v44, %v1737_v59  ;;  %v1755_v28 = vcombine.high %v1721_v44, %v1737_v59 }
 0x724   : > { %v1746_v29 = vrot.slane %v1738_v43, %v5437_v5  ;;  %v1753_v30 = vrot.slane %v1739_v26, %v5437_v5  ;;  %v1762_v31 = vrot.slane %v1754_v27, %v5437_v5  ;;  %v1769_v38 = vrot.slane %v1755_v28, %v5437_v5  ;;  %v4208_v56 = vpop.eup %4207 }
 0x725   : > { %v2382_v2 = vmul.f32 %v4208_v56, %v5658_v10 }
 0x726   : > { %v1842_v50 = vcombine.low %v1746_v29, %v1753_v30  ;;  %v3764_v33 = vcombine.high %v1746_v29, %v1753_v30  ;;  %v1858_v35 = vcombine.low %v1762_v31, %v1769_v38  ;;  %v3765_v12 = vcombine.high %v1762_v31, %v1769_v38 }
 0x727   : > { %v2368_v39 = vpop.xlane.xlu1 %2367  ;;  %v2390_v13 = vpack.c.bf16 %v2382_v2, %v2382_v2 }
 0x728   : > { %v1849_v46 = vrot.slane %v1842_v50, %v5434_v62  ;;  %v1857_v32 = vrot.slane %v3764_v33, %v5434_v62  ;;  %v1865_v36 = vrot.slane %v1858_v35, %v5434_v62  ;;  %v1873_v37 = vrot.slane %v3765_v12, %v5434_v62 }
 0x729   : > { %4209 = vrcp.f32 %v2368_v39 }
 0x72a   : > { %v1874_v58 = vcombine.low %v1849_v46, %v1857_v32  ;;  %v1890_v60 = vcombine.low %v1865_v36, %v1873_v37  ;;  %v1875_v61 = vcombine.high %v1849_v46, %v1857_v32  ;;  %v1891_v63 = vcombine.high %v1865_v36, %v1873_v37 }
 0x72c   : > { %v1882_v6 = vrot.slane %v1874_v58, %v5437_v5  ;;  %v1898_v7 = vrot.slane %v1890_v60, %v5437_v5  ;;  %v1889_v54 = vrot.slane %v1875_v61, %v5437_v5  ;;  %v1905_v55 = vrot.slane %v1891_v63, %v5437_v5 }
 0x72e   : > { %v1906_v42 = vcombine.low %v1882_v6, %v1898_v7  ;;  %v1907_v47 = vcombine.high %v1882_v6, %v1898_v7  ;;  %v1908_v1 = vcombine.low %v1889_v54, %v1905_v55  ;;  %v1909_v15 = vcombine.high %v1889_v54, %v1905_v55 }
 0x730   : > { %v1914_v8 = vpack.c.bf16 %v1906_v42, %v1906_v42  ;;  %v1915_v48 = vpack.c.bf16 %v1907_v47, %v1907_v47  ;;  %v1916_v9 = vpack.c.bf16 %v1908_v1, %v1908_v1  ;;  %v1917_v14 = vpack.c.bf16 %v1909_v15, %v1909_v15 }
 0x732   : > { %v2582_v34 = vsel %vm2396_vm5, %v1914_v8, 0  ;;  %v2628_v49 = vsel %vm2396_vm5, %v1915_v48, 0  ;;  %v2674_v53 = vsel %vm2396_vm5, %v1916_v9, 0  ;;  %v2720_v10 = vsel %vm2396_vm5, %v1917_v14, 0 }
 0x733   : > { %3944 = vmatpush3.bf16.msra.mxu1 %v2582_v34  ;;  %3950 = vmatpush3.bf16.msra.mxu0 %v2628_v49  ;;  %v4210_v57 = vpop.eup %4209 }
 0x734   : > { %3955 = vmatprep.subr.bf16.mxu1 %v4738_v17  ;;  %3961 = vmatprep.subr.bf16.mxu0 %v4738_v17  ;;  %v2384_v40 = vmul.f32 %v4210_v57, %v5674_v51 }
 0x736   : > { %3946 = vmatmul.mubr.msk.bf16.vlgmr.msra.gmra.mrb[20].mxu1 %vm1918_vm3, %v2389_v16  ;;  %3952 = vmatmul.mubr.msk.bf16.vlgmr.msra.gmra.mrb[32].mxu0 %vm1918_vm3, %v2390_v13  ;;  %v2392_v41 = vpack.c.bf16 %v2384_v40, %v2384_v40 }
 0x737   : > { %3956 = vmatpush3.bf16.msra.mxu1 %v2674_v53  ;;  %3962 = vmatpush3.bf16.msra.mxu0 %v2720_v10 }
 0x738   : > { %3963 = vmatprep.mubr.msk.bf16.mxu0 %vm4739_vm2, %v4738_v17  ;;  %3957 = vmatprep.mubr.msk.bf16.mxu1 %vm4739_vm2, %v4738_v17 }
 0x739   : > { %3967 = vmatprep.subr.bf16.mxu1 %v4738_v17  ;;  %3975 = vmatprep.subr.bf16.mxu0 %v4738_v17 }
 0x73e   : > { %3964 = vmatmul.mubr.msk.bf16.vlgmr.msra.gmra.mrb[36].mxu0 %vm1918_vm3, %v2392_v41 }
 0x73f   : > { %3979 = vmatprep.mubr.msk.bf16.mxu0 %vm4739_vm2, %v4738_v17 }
 0x74e   : > { %v2365_v45 = vpop.xlane.xlu0 %2364 }
 0x74f   : > { %4211 = vrcp.f32 %v2365_v45 }
 0x759   : > { %v4212_v52 = vpop.eup %4211 }
 0x75a   : > { %v2383_v51 = vmul.f32 %v4212_v52, %v5686_v4 }
 0x75c   : > { %v2391_v11 = vpack.c.bf16 %v2383_v51, %v2383_v51 }
 0x75e   : > { %3958 = vmatmul.mubr.msk.bf16.vlgmr.msra.gmra.mrb[24].mxu1 %vm1918_vm3, %v2391_v11 }
 0x75f   : > { %3971 = vmatprep.mubr.msk.bf16.mxu1 %vm4739_vm2, %v4738_v17 }
 0x7bb   : > { %v2434_v18 = vpop.f32.mrb[12].mxu1 }
 0x7bc   : > { %v3923_v20 = vpop.f32.mrb[13].mxu1 }
 0x7bd   : > { %v2437_v19 = vpop.f32.mrb[14].mxu1 }
 0x7be   : > { %v3924_v21 = vpop.f32.mrb[15].mxu1 }
 0x7c3   : > { %v2480_v22 = vpop.f32.mrb[24].mxu0  ;;  %v2526_v23 = vpop.f32.mrb[16].mxu1 }
 0x7c4   : > { %v2762_v24 = vcombine.low %v2434_v18, %v2526_v23  ;;  %v2763_v59 = vcombine.high %v2434_v18, %v2526_v23  ;;  %v3929_v25 = vpop.f32.mrb[25].mxu0  ;;  %v3935_v44 = vpop.f32.mrb[17].mxu1 }
 0x7c5   : > { %v2483_v43 = vpop.f32.mrb[26].mxu0  ;;  %v2529_v26 = vpop.f32.mrb[18].mxu1 }
 0x7c6   : > { %v3930_v27 = vpop.f32.mrb[27].mxu0  ;;  %v3936_v4 = vpop.f32.mrb[19].mxu1  ;;  %v2770_v50 = vrot.slane %v2762_v24, %v5434_v62  ;;  %v2777_v33 = vrot.slane %v2763_v59, %v5434_v62 }
 0x7cc   : > { %v2572_v28 = vpop.f32.mrb[28].mxu0 }
 0x7cd   : > { %v2778_v29 = vcombine.low %v2480_v22, %v2572_v28  ;;  %v2779_v30 = vcombine.high %v2480_v22, %v2572_v28  ;;  %v3941_v31 = vpop.f32.mrb[29].mxu0 }
 0x7ce   : > { %v2575_v38 = vpop.f32.mrb[30].mxu0 }
 0x7cf   : > { %v2786_v35 = vrot.slane %v2778_v29, %v5434_v62  ;;  %v2793_v12 = vrot.slane %v2779_v30, %v5434_v62  ;;  %v3942_v46 = vpop.f32.mrb[31].mxu0 }
 0x7d1   : > { %v2794_v32 = vcombine.low %v2770_v50, %v2786_v35  ;;  %v2795_v36 = vcombine.high %v2770_v50, %v2786_v35  ;;  %v2810_v37 = vcombine.low %v2777_v33, %v2793_v12  ;;  %v2811_v39 = vcombine.high %v2777_v33, %v2793_v12 }
 0x7d3   : > { %v2802_v58 = vrot.slane %v2794_v32, %v5437_v5  ;;  %v2809_v60 = vrot.slane %v2795_v36, %v5437_v5  ;;  %v2818_v61 = vrot.slane %v2810_v37, %v5437_v5  ;;  %v2825_v63 = vrot.slane %v2811_v39, %v5437_v5  ;;  %v4165_v39 = vld [vmem:[%s718_s8] sm:$0xff]  }
 0x7d4   : > { %3968 = vmatpush3.bf16.msra.mxu1 %v4165_v39 }
 0x7d5   : > { %v2898_v3 = vcombine.low %v2802_v58, %v2809_v60  ;;  %v3782_v6 = vcombine.high %v2802_v58, %v2809_v60  ;;  %v2914_v7 = vcombine.low %v2818_v61, %v2825_v63  ;;  %v3783_v54 = vcombine.high %v2818_v61, %v2825_v63  ;;  %3969 = vmatprep.subr.bf16.mxu1 %v4738_v17 }
 0x7d7   : > { %v2905_v55 = vrot.slane %v2898_v3, %v5434_v62  ;;  %v2913_v56 = vrot.slane %v3782_v6, %v5434_v62  ;;  %v2921_v42 = vrot.slane %v2914_v7, %v5434_v62  ;;  %v2929_v47 = vrot.slane %v3783_v54, %v5434_v62 }
 0x7d9   : > { %v2931_v1 = vcombine.high %v2905_v55, %v2913_v56  ;;  %v2947_v15 = vcombine.high %v2921_v42, %v2929_v47  ;;  %v2930_v0 = vcombine.low %v2905_v55, %v2913_v56  ;;  %v2946_v2 = vcombine.low %v2921_v42, %v2929_v47 }
 0x7db   : > { %v5763_v8 = vrot.slane %v2931_v1, %v5437_v5  ;;  %v5766_v48 = vrot.slane %v2947_v15, %v5437_v5  ;;  %v5769_v34 = vrot.slane %v2930_v0, %v5437_v5  ;;  %v5772_v49 = vrot.slane %v2946_v2, %v5437_v5  ;;  %v4166_v1 = vld [vmem:[%s718_s8 + $0x8] sm:$0xff]   ;;  %s4750_s8 = smov [#allocation23]  }
 0x7dc   : > { %3970 = vmatpush3.bf16.msra.mxu1 %v4166_v1 }
 0x7dd   : > { %v2964_v9 = vcombine.low %v5763_v8, %v5766_v48  ;;  %v2962_v14 = vcombine.low %v5769_v34, %v5772_v49  ;;  %v2963_v16 = vcombine.high %v5769_v34, %v5772_v49  ;;  %v2965_v13 = vcombine.high %v5763_v8, %v5766_v48  ;;  %3983 = vmatprep.subr.bf16.mxu1 %v4738_v17  ;;  %v3786_v34 = vld [vmem:[%s726_s13] ss:$0 sm:$0xff]  ;;  %s3428_s13 = sshll.u32 %s4750_s8, 4  ;;  %s3429_s13 = int_to_ptr.vmem [resolvable:$true] %s3428_s13 }
 0x7de   : > { %s4615_s14 = scalar_lea.vmem %s3429_s13, 256  ;;  %p4622_p4 = scmp.lt.s32.totalorder %s3429_s13, %s3429_s13 }
 0x7df   : > { %p4616_p5 = scmp.ne.s32.totalorder %s3429_s13, %s4615_s14  ;;  %p4623_p13 = scmp.lt.s32.totalorder %s4615_s14, %s4615_s14 }
 0x7e1   : > { %p4617_p10 = pnand %p4616_p5, %p4079_p2  ;;  %p4624_p8 = por %p4623_p13, %p4622_p4 }
 0x7e3   : > { %p4618_p1 = pneg %p4617_p10 }
 0x7e5   : > { %p4625_p6 = pnand %p4624_p8, %p4618_p1 }
 0x809   : > { %v2618_v57 = vpop.f32.mrb[20].mxu1  ;;  %v2664_v53 = vpop.f32.mrb[32].mxu0 }
 0x80a   : > { %v3947_v10 = vpop.f32.mrb[21].mxu1  ;;  %v3953_v40 = vpop.f32.mrb[33].mxu0 }
 0x80b   : > { %v2621_v41 = vpop.f32.mrb[22].mxu1  ;;  %v2667_v45 = vpop.f32.mrb[34].mxu0 }
 0x80c   : > { %v3948_v52 = vpop.f32.mrb[23].mxu1  ;;  %v3954_v51 = vpop.f32.mrb[35].mxu0 }
 0x811   : > { %v2756_v11 = vpop.f32.mrb[36].mxu0 }
 0x812   : > { %v2846_v18 = vcombine.low %v2664_v53, %v2756_v11  ;;  %v2847_v20 = vcombine.high %v2664_v53, %v2756_v11  ;;  %v3965_v19 = vpop.f32.mrb[37].mxu0 }
 0x813   : > { %v2759_v21 = vpop.f32.mrb[38].mxu0 }
 0x814   : > { %v3966_v22 = vpop.f32.mrb[39].mxu0  ;;  %v2854_v43 = vrot.slane %v2846_v18, %v5434_v62  ;;  %v2861_v26 = vrot.slane %v2847_v20, %v5434_v62 }
 0x831   : > { %v2710_v23 = vpop.f32.mrb[24].mxu1 }
 0x832   : > { %v2830_v24 = vcombine.low %v2618_v57, %v2710_v23  ;;  %v2831_v59 = vcombine.high %v2618_v57, %v2710_v23  ;;  %v3959_v25 = vpop.f32.mrb[25].mxu1 }
 0x833   : > { %v2713_v44 = vpop.f32.mrb[26].mxu1 }
 0x834   : > { %v2838_v27 = vrot.slane %v2830_v24, %v5434_v62  ;;  %v2845_v4 = vrot.slane %v2831_v59, %v5434_v62  ;;  %v3960_v28 = vpop.f32.mrb[27].mxu1  ;;  %v4225_v24 = vld [vmem:[#allocation23] sm:$0xff] }
 0x836   : > { %v2862_v29 = vcombine.low %v2838_v27, %v2854_v43  ;;  %v2863_v30 = vcombine.high %v2838_v27, %v2854_v43  ;;  %v2878_v31 = vcombine.low %v2845_v4, %v2861_v26  ;;  %v2879_v38 = vcombine.high %v2845_v4, %v2861_v26  ;;  %v4226_v43 = vld [vmem:[#allocation23 + $0x8] sm:$0xff] }
 0x838   : > { %v2870_v50 = vrot.slane %v2862_v29, %v5437_v5  ;;  %v2877_v33 = vrot.slane %v2863_v30, %v5437_v5  ;;  %v2886_v35 = vrot.slane %v2878_v31, %v5437_v5  ;;  %v2893_v12 = vrot.slane %v2879_v38, %v5437_v5 }
 0x83a   : > { %v2966_v46 = vcombine.low %v2870_v50, %v2877_v33  ;;  %v3784_v32 = vcombine.high %v2870_v50, %v2877_v33  ;;  %v2982_v36 = vcombine.low %v2886_v35, %v2893_v12  ;;  %v3785_v37 = vcombine.high %v2886_v35, %v2893_v12 }
 0x83c   : > { %v2973_v58 = vrot.slane %v2966_v46, %v5434_v62  ;;  %v2981_v60 = vrot.slane %v3784_v32, %v5434_v62  ;;  %v2989_v61 = vrot.slane %v2982_v36, %v5434_v62  ;;  %v2997_v63 = vrot.slane %v3785_v37, %v5434_v62  ;;  %v4167_v32 = vld [vmem:[%s751_s0] sm:$0xff]   ;;  %v4168_v36 = vld [vmem:[%s751_s0 + $0x8] sm:$0xff]  }
 0x83d   : > { %3976 = vmatpush3.bf16.msra.mxu0 %v4167_v32 }
 0x83e   : > { %v2999_v3 = vcombine.high %v2973_v58, %v2981_v60  ;;  %v3015_v6 = vcombine.high %v2989_v61, %v2997_v63  ;;  %v2998_v7 = vcombine.low %v2973_v58, %v2981_v60  ;;  %v3014_v54 = vcombine.low %v2989_v61, %v2997_v63  ;;  %3977 = vmatprep.subr.bf16.mxu0 %v4738_v17 }
 0x840   : > { %v3013_v55 = vrot.slane %v2999_v3, %v5437_v5  ;;  %v3029_v56 = vrot.slane %v3015_v6, %v5437_v5  ;;  %v3006_v42 = vrot.slane %v2998_v7, %v5437_v5  ;;  %v3022_v47 = vrot.slane %v3014_v54, %v5437_v5  ;;  %v3790_v7 = vld [vmem:[%s734_s18] ss:$0 sm:$0xff] }
 0x841   : > { %3978 = vmatpush3.bf16.msra.mxu0 %v4168_v36 }
 0x842   : > { %v3032_v15 = vcombine.low %v3013_v55, %v3029_v56  ;;  %v3031_v0 = vcombine.high %v3006_v42, %v3022_v47  ;;  %v3030_v62 = vcombine.low %v3006_v42, %v3022_v47  ;;  %v3033_v2 = vcombine.high %v3013_v55, %v3029_v56  ;;  %v3791_v42 = vld [vmem:[%s5988_s27] ss:$0 sm:$0xff] }
 0x844   : > { %v4153_v8 = vpack.i.bf16 %v3032_v15, %v2964_v9  ;;  %v4148_v48 = vpack.i.bf16 %v3031_v0, %v2963_v16  ;;  %v4158_v57 = vpack.i.bf16 %v3033_v2, %v2965_v13  ;;  %v4170_v2 = vld [vmem:[%s5352_s5 + $0x8] sm:$0xff]  }
 0x846   : > { %4154 = vrot.lane.b32.xlu1 %v4153_v8, %s4747_s10  ;;  %4149 = vrot.lane.b32.xlu0 %v4148_v48, %s4748_s19  ;;  %v4171_v8 = vld [vmem:[%s5352_s5 + $0x10] sm:$0xff]   ;;  %v4172_v48 = vld [vmem:[%s5352_s5 + $0x18] sm:$0xff]  }
 0x84a   : > { %4159 = vrot.lane.b32.xlu0 %v4158_v57, %s4749_s16  ;;  %v4173_v57 = vld [vmem:[%s5352_s5 + $0x20] sm:$0xff]  }
 0x8b8   : > { %v4155_v5 = vpop.permute.xlu1 %4154  ;;  %v4150_v53 = vpop.permute.xlu0 %4149 }
 0x8b9   : > { %v4152_v10 = vunpack.i.h.bf16 %v4150_v53  ;;  %v4151_v40 = vunpack.i.l.bf16 %v4150_v53  ;;  %v4157_v41 = vunpack.i.h.bf16 %v4155_v5  ;;  %v4156_v45 = vunpack.i.l.bf16 %v4155_v5  ;;  %v4174_v5 = vld [vmem:[%s5352_s5 + $0x28] sm:$0xff]   ;;  %v4175_v53 = vld [vmem:[%s5352_s5 + $0x30] sm:$0xff]  }
 0x8bb   : > { %v3058_v9 = vsel %vm1918_vm3, %v2962_v14, %v4151_v40  ;;  %v3059_v16 = vsel %vm1918_vm3, %v3030_v62, %v4152_v10  ;;  %v4169_v62 = vld [vmem:[%s5352_s5] sm:$0xff]   ;;  %v4176_v10 = vld [vmem:[%s5352_s5 + $0x38] sm:$0xff]  }
 0x8bc   : > { %v4160_v13 = vpop.permute.xlu0 %4159  ;;  %v3061_v11 = vsel %vm3060_vm6, %v3058_v9, %v4156_v45  ;;  %v3062_v18 = vsel %vm3060_vm6, %v3059_v16, %v4157_v41  ;;  %v3792_v40 = vld [vmem:[%s759_s17] ss:$0 sm:$0xff] }
 0x8bd   : > { %v4162_v52 = vunpack.i.h.bf16 %v4160_v13  ;;  %v4161_v51 = vunpack.i.l.bf16 %v4160_v13 }
 0x8bf   : > { %v3064_v20 = vsel %vm3063_vm7, %v3061_v11, %v4161_v51  ;;  %v3065_v19 = vsel %vm3063_vm7, %v3062_v18, %v4162_v52 }
 0x8c0   : > { %v3066_v21 = vpack.c.bf16 %v3065_v19, %v3064_v20 }
 0x8c2   : > { %3972 = vmatmul.mubr.msk.bf16.vlgmr.msra.gmra.mrb[28].mxu1 %vm882_vm1, %v3066_v21 }
 0x8c3   : > { %3999 = vmatprep.mubr.msk.bf16.mxu1 %vm4739_vm2, %v4738_v17  ;;  %3984 = vmatpush3.bf16.msra.mxu1 %v4169_v62 }
 0x8c4   : > { %3985 = vmatprep.subr.bf16.mxu1 %v4738_v17 }
 0x8c7   : > { %3986 = vmatpush3.bf16.msra.mxu1 %v4170_v2 }
 0x8c8   : > { %3987 = vmatprep.subr.bf16.mxu1 %v4738_v17 }
 0x8cb   : > { %3988 = vmatpush3.bf16.msra.mxu1 %v4171_v8 }
 0x8cc   : > { %3989 = vmatprep.subr.bf16.mxu1 %v4738_v17 }
 0x8cf   : > { %3990 = vmatpush3.bf16.msra.mxu1 %v4172_v48 }
 0x8d0   : > { %3991 = vmatprep.subr.bf16.mxu1 %v4738_v17 }
 0x8d3   : > { %3992 = vmatpush3.bf16.msra.mxu1 %v4173_v57  ;;  %v3796_v57 = vld [vmem:[%s776_s3] ss:$0 sm:$0xff] }
 0x8d4   : > { %3993 = vmatprep.subr.bf16.mxu1 %v4738_v17 }
 0x8d7   : > { %3994 = vmatpush3.bf16.msra.mxu1 %v4174_v5 }
 0x8d8   : > { %3995 = vmatprep.subr.bf16.mxu1 %v4738_v17 }
 0x8db   : > { %3996 = vmatpush3.bf16.msra.mxu1 %v4175_v53 }
 0x8dc   : > { %3997 = vmatprep.subr.bf16.mxu1 %v4738_v17 }
 0x8df   : > { %3998 = vmatpush3.bf16.msra.mxu1 %v4176_v10 }
 0x995   : > { %v3127_v49 = vpop.f32.mrb[28].mxu1 }
 0x996   : > { %v3128_v14 = vadd.f32 %v3786_v34, %v3127_v49  ;;  %v3973_v22 = vpop.f32.mrb[29].mxu1 }
 0x997   : > { %v3130_v23 = vpop.f32.mrb[30].mxu1 }
 0x998   : > { %v5815_v59 = vadd.f32 %v4225_v24, %v3128_v14  ;;  %v3131_v25 = vadd.f32 %v3786_v34, %v3130_v23  ;;  %v3974_v44 = vpop.f32.mrb[31].mxu1 }
 0x99a   : > { %v5817_v26 = vadd.f32 %v4226_v43, %v3131_v25  ;;  %v3138_v27 = vsel %vm882_vm1, %v5815_v59, 0.0 }
 0x99b   : > { %3139 = vadd.xlane.f32.xlu1 %v3138_v27 }
 0x99c   : > { %v3141_v4 = vsel %vm882_vm1, %v5817_v26, 0.0 }
 0x99d   : > { %3142 = vadd.xlane.f32.xlu0 %v3141_v4 }
 0xa28   : > { %v3140_v28 = vpop.xlane.xlu1 %3139 }
 0xa29   : > { %v3144_v29 = vmul.f32 0.03125, %v3140_v28 }
 0xa2a   : > { %v3143_v30 = vpop.xlane.xlu0 %3142 }
 0xa2b   : > { %v3146_v31 = vsub.f32 %v5815_v59, %v3144_v29  ;;  %v3145_v38 = vmul.f32 0.03125, %v3143_v30 }
 0xa2d   : > { %v3147_v50 = vsub.f32 %v5817_v26, %v3145_v38  ;;  %v3148_v33 = vmul.f32 %v3146_v31, %v3146_v31 }
 0xa2f   : > { %v3150_v35 = vsel %vm882_vm1, %v3148_v33, 0.0  ;;  %v3149_v12 = vmul.f32 %v3147_v50, %v3147_v50 }
 0xa30   : > { %3151 = vadd.xlane.f32.xlu0 %v3150_v35 }
 0xa31   : > { %v3153_v46 = vsel %vm882_vm1, %v3149_v12, 0.0 }
 0xa34   : > { %3154 = vadd.xlane.f32.xlu0 %v3153_v46 }
 0xabd   : > { %v3152_v37 = vpop.xlane.xlu0 %3151 }
 0xabe   : > { %v3156_v39 = vmul.f32 0.03125, %v3152_v37 }
 0xac0   : > { %v3158_v58 = vadd.f32 1e-05, %v3156_v39 }
 0xac1   : > { %v3155_v60 = vpop.xlane.xlu0 %3154 }
 0xac2   : > { %4213 = vrsqrt.f32 %v3158_v58  ;;  %v3157_v61 = vmul.f32 0.03125, %v3155_v60 }
 0xac4   : > { %v3159_v63 = vadd.f32 1e-05, %v3157_v61 }
 0xac6   : > { %4215 = vrsqrt.f32 %v3159_v63 }
 0xacc   : > { %v4214_v3 = vpop.eup %4213 }
 0xacd   : > { %v3162_v6 = vmul.f32 %v4214_v3, %v3146_v31 }
 0xacf   : > { %v3170_v55 = vmul.f32 %v3790_v7, %v3162_v6 }
 0xad0   : > { %v4216_v54 = vpop.eup %4215 }
 0xad1   : > { %v3163_v56 = vmul.f32 %v4216_v54, %v3147_v50  ;;  %v3178_v1 = vadd.f32 %v3791_v42, %v3170_v55 }
 0xad3   : > { %v3171_v47 = vmul.f32 %v3790_v7, %v3163_v56 }
 0xad5   : > { %v3179_v15 = vadd.f32 %v3791_v42, %v3171_v47 }
 0xad7   : > { %v3180_v0 = vpack.c.bf16 %v3179_v15, %v3178_v1 }
 0xad9   : > { %3980 = vmatmul.mubr.msk.bf16.vlgmr.msra.gmra.mrb[40].mxu0 %vm882_vm1, %v3180_v0 }
 0xbac   : > { %v3241_v41 = vpop.f32.mrb[40].mxu0 }
 0xbad   : > { %v3242_v45 = vadd.f32 %v3792_v40, %v3241_v41  ;;  %v3981_v9 = vpop.f32.mrb[41].mxu0 }
 0xbae   : > { %v3244_v16 = vpop.f32.mrb[42].mxu0 }
 0xbaf   : > { %v3250_v13 = vmul.f32 0.70710677, %v3242_v45  ;;  %v3245_v52 = vadd.f32 %v3792_v40, %v3244_v16  ;;  %v3982_v51 = vpop.f32.mrb[43].mxu0  ;;  %v3248_v15 = vmul.f32 0.5, %v3242_v45 }
 0xbb1   : > { %v3252_v11 = vand.u32 2147483647, %v3250_v13  ;;  %v3251_v18 = vmul.f32 0.70710677, %v3245_v52  ;;  %vm3292_vm8 = vcmp.lt.f32.partialorder %v3250_v13, 0.0  ;;  %v3249_v0 = vmul.f32 0.5, %v3245_v52 }
 0xbb3   : > { %v3254_v20 = vmul.f32 0.3275911, %v3252_v11  ;;  %v3253_v19 = vand.u32 2147483647, %v3251_v18  ;;  %v3280_v17 = vmul.f32 %v3252_v11, %v3252_v11  ;;  %vm3293_vm9 = vcmp.lt.f32.partialorder %v3251_v18, 0.0 }
 0xbb5   : > { %v3256_v21 = vadd.f32 1.0, %v3254_v20  ;;  %v3255_v34 = vmul.f32 0.3275911, %v3253_v19  ;;  %v3281_v14 = vmul.f32 %v3253_v19, %v3253_v19  ;;  %v3282_v23 = vsub.f32 0.0, %v3280_v17 }
 0xbb7   : > { %4217 = vrcp.f32 %v3256_v21  ;;  %v3257_v49 = vadd.f32 1.0, %v3255_v34  ;;  %v3283_v43 = vsub.f32 0.0, %v3281_v14  ;;  %v3284_v27 = vmul.f32 1.442695, %v3282_v23 }
 0xbb9   : > { %4219 = vrcp.f32 %v3257_v49  ;;  %v3286_v31 = vmul.f32 1.442695, %v3283_v43 }
 0xbba   : > { %4221 = vpow2.f32 %v3284_v27 }
 0xbbb   : > { %4223 = vpow2.f32 %v3286_v31 }
 0xbc1   : > { %v4218_v22 = vpop.eup %4217 }
 0xbc2   : > { %v3262_v24 = vmul.f32 1.0614054, %v4218_v22 }
 0xbc3   : > { %v4220_v25 = vpop.eup %4219 }
 0xbc4   : > { %v3264_v44 = vadd.f32 -1.4531521, %v3262_v24  ;;  %v3263_v4 = vmul.f32 1.0614054, %v4220_v25  ;;  %v4222_v58 = vpop.eup %4221 }
 0xbc5   : > { %v4224_v3 = vpop.eup %4223 }
 0xbc6   : > { %v3266_v28 = vmul.f32 %v4218_v22, %v3264_v44  ;;  %v3265_v29 = vadd.f32 -1.4531521, %v3263_v4 }
 0xbc8   : > { %v3268_v30 = vadd.f32 1.4214138, %v3266_v28  ;;  %v3267_v38 = vmul.f32 %v4220_v25, %v3265_v29 }
 0xbca   : > { %v3270_v50 = vmul.f32 %v4218_v22, %v3268_v30  ;;  %v3269_v33 = vadd.f32 1.4214138, %v3267_v38 }
 0xbcc   : > { %v3272_v35 = vadd.f32 -0.28449672, %v3270_v50  ;;  %v3271_v12 = vmul.f32 %v4220_v25, %v3269_v33 }
 0xbce   : > { %v3274_v46 = vmul.f32 %v4218_v22, %v3272_v35  ;;  %v3273_v32 = vadd.f32 -0.28449672, %v3271_v12 }
 0xbd0   : > { %v3276_v36 = vadd.f32 0.2548296, %v3274_v46  ;;  %v3275_v37 = vmul.f32 %v4220_v25, %v3273_v32 }
 0xbd2   : > { %v3278_v39 = vmul.f32 %v4218_v22, %v3276_v36  ;;  %v3277_v60 = vadd.f32 0.2548296, %v3275_v37 }
 0xbd4   : > { %v3288_v61 = vmul.f32 %v4222_v58, %v3278_v39  ;;  %v3279_v63 = vmul.f32 %v4220_v25, %v3277_v60 }
 0xbd6   : > { %v3290_v6 = vsub.f32 1.0, %v3288_v61  ;;  %v3289_v7 = vmul.f32 %v4224_v3, %v3279_v63 }
 0xbd8   : > { %v3294_v54 = vsub.f32 0.0, %v3290_v6  ;;  %v3291_v55 = vsub.f32 1.0, %v3289_v7 }
 0xbda   : > { %v3296_v56 = vsel %vm3292_vm8, %v3294_v54, %v3290_v6  ;;  %v3295_v42 = vsub.f32 0.0, %v3291_v55 }
 0xbdb   : > { %v3298_v47 = vadd.f32 1.0, %v3296_v56 }
 0xbdc   : > { %v3297_v1 = vsel %vm3293_vm9, %v3295_v42, %v3291_v55 }
 0xbdd   : > { %v3299_v62 = vadd.f32 1.0, %v3297_v1  ;;  %v3300_v2 = vmul.f32 %v3298_v47, %v3248_v15 }
 0xbdf   : > { %v3301_v8 = vmul.f32 %v3299_v62, %v3249_v0 }
 0xbe1   : > { %v3302_v48 = vpack.c.bf16 %v3301_v8, %v3300_v2 }
 0xbe3   : > { %4000 = vmatmul.mubr.bf16.vlgmr.msra.gmra.mrb[32].mxu1 %v3302_v48 }
 0xcb6   : > { %v3408_v5 = vpop.f32.mrb[32].mxu1 }
 0xcb7   : > { %v3409_v53 = vadd.f32 %v3796_v57, %v3408_v5  ;;  %v4001_v10 = vpop.f32.mrb[33].mxu1 }
 0xcb8   : > { %v3411_v40 = vpop.f32.mrb[34].mxu1 }
 0xcb9   : > { %v3415_v41 = vadd.f32 %v3409_v53, %v5815_v59  ;;  %v3412_v9 = vadd.f32 %v3796_v57, %v3411_v40  ;;  %v4002_v45 = vpop.f32.mrb[35].mxu1 }
 0xcbb   : > { %3417 = vst.msk [vmem:[#allocation23] sm:$0xff] %vm882_vm1, %v3415_v41  ;;  %v3416_v16 = vadd.f32 %v3412_v9, %v5817_v26 }
 0xcbd   : > { %3418 = vst.msk [vmem:[#allocation23 + $0x8] sm:$0xff] %vm882_vm1, %v3416_v16 }
 0xcbe   : > { %4628 = shalt.err (!%p4625_p6)
}
 0xcbf   : > { %s5989_s15 = sld [smem:[#allocation44_spill]] }
 0xcc5   : > { %s4629_s17 = scalar_lea.hbm %s5989_s15, 256 }
 0xcc6   : > { %p4630_p11 = scmp.ne.s32.totalorder %s5989_s15, %s4629_s17  ;;  %p4635_p9 = scmp.lt.u32.totalorder %s4629_s17, %s5989_s15 }
 0xcc8   : > { %p4631_p3 = pnand %p4630_p11, %p4079_p2 }
 0xcca   : > { %p4632_p0 = pneg %p4631_p3 }
 0xccc   : > { %p4637_p12 = pnand %p4635_p9, %p4632_p0 }
 0xcce   : > { %4640 = shalt.err (!%p4637_p12)
}
 0xccf   : > { %s4751_s21 = smov 128  }
 0xcd0   : > { %4032 = dma.vmem_to_hbm [thread:$0]  (%p4079_p2), %s3429_s13, 256, %s5989_s15, [#allocation4], %s4751_s21, %s4751_s21, %s4748_s19  }
 0xcd1   : > { %4694 = dma.done.wait (%p4079_p2), [#allocation4], 256  }
 0xcd2   : > { %4696 = vsyncadd (%p4079_p2), [#allocation4], 4294967040 }
 0xcd3 PF: > { %s43_s30 = sadd.s32 1, %s4719_s30   ;;  %s5990_s12 = sld [smem:[#allocation32_spill]] }
 0xcd4   : > { %p40_p7 = scmp.ge.s32.totalorder %s43_s30, 4   ;;  %s5991_s27 = sld [smem:[#allocation35_spill]] }
 0xcd5   : > { %s5992_s10 = sld [smem:[#allocation34_spill]]  ;;  %s5993_s25 = smov %s4703_s26 }
 0xcd6   : > { %s5995_s28 = smov %s4715_s29  ;;  %42 = sbr.rel (!%p40_p7) target bundleno = 26 (0x1a), region = 251 }
 0xcd9   : > { %s5994_s26 = smov %s5990_s12 }
 0xcdb   : > { %s5996_s29 = smov %s5992_s10 }
 0xcdd   :  { %3444 = vsyncpa [#allocation3], 1 }
 0xcde   :  { %3446 = vsyncpa [#allocation3 + $0x1], 1 }
 0xcdf   :  { %3447 = vsyncpa [#allocation6], 1 }
 0xce0   :  { %3449 = vsyncpa [#allocation6 + $0x1], 1 }
 0xce1   :  { %3450 = vsyncpa [#allocation9], 1 }
 0xce2   :  { %3452 = vsyncpa [#allocation9 + $0x1], 1 }
 0xce3   :  { %3453 = vsyncpa [#allocation12], 1 }
 0xce4   :  { %3455 = vsyncpa [#allocation12 + $0x1], 1 }
 0xce5   :  { %3456 = vsyncpa [#allocation15], 1 }
 0xce6   :  { %3458 = vsyncpa [#allocation15 + $0x1], 1 }
 0xce7   :  { %3459 = vsyncpa [#allocation18], 1 }
 0xce8   :  { %3461 = vsyncpa [#allocation18 + $0x1], 1 }
 0xce9   :  { %3462 = vsyncpa [#allocation21], 1 }
 0xcea   :  { %3464 = vsyncpa [#allocation21 + $0x1], 1 }
 0xceb   :  { %3465 = vsyncpa [#allocation4], 1 }
 0xcec   :  { %3467 = vsyncpa [#allocation4 + $0x1], 1 }

</bundles_post_ra>
